<compile_context>
chip_gen: v7x
topology: tpu7x:2x2x1
jax: 0.10.0
libtpu: 0.0.40
codegen_flags: <defaults>
</compile_context>

<pallas_src>
import functools

import jax
import jax.numpy as jnp
from jax.experimental import pallas as pl
from jax.experimental.pallas import tpu as pltpu

_BN_EPS = 1e-5
_LANE = 128
_SUBLANE = 8
_TILE_M = 512                      # im2col rows per grid step
_VMEM_LIMIT = 48 * 1024 * 1024     # explicit scoped-VMEM budget (< v7x 64 MiB)


def _round_up(n, m):
    return ((n + m - 1) // m) * m


# --------------------------- Pallas kernels ---------------------------------

def _conv_stats_kernel(p_ref, w_ref, y_ref, sum_ref, ssq_ref):
    """y = patches @ w (full K, f32 accumulation, weight VMEM-resident)
    plus per-M-tile per-channel BN partial stats taken from the f32 values."""
    y = jnp.dot(p_ref[...], w_ref[...], preferred_element_type=jnp.float32)
    y_ref[...] = y.astype(y_ref.dtype)
    s = jnp.sum(y, axis=0, keepdims=True)        # (1, Cp) per-channel sum
    q = jnp.sum(y * y, axis=0, keepdims=True)    # (1, Cp) per-channel sumsq
    # Replicate across 8 sublanes so the output block is (8, Cp)-aligned.
    sum_ref[...] = jnp.broadcast_to(s, sum_ref.shape)
    ssq_ref[...] = jnp.broadcast_to(q, ssq_ref.shape)


def _bn_relu_kernel(y_ref, scale_ref, shift_ref, out_ref):
    h = y_ref[...].astype(jnp.float32) * scale_ref[...] + shift_ref[...]
    out_ref[...] = jnp.maximum(h, 0.0).astype(out_ref.dtype)


def _bn_add_relu_kernel(y_ref, scale_ref, shift_ref, res_ref, out_ref):
    h = (y_ref[...].astype(jnp.float32) * scale_ref[...] + shift_ref[...]
         + res_ref[...].astype(jnp.float32))
    out_ref[...] = jnp.maximum(h, 0.0).astype(out_ref.dtype)


def _bn_skipconv_add_relu_kernel(y_ref, scale_ref, shift_ref,
                                 sp_ref, sw_ref, out_ref):
    res = jnp.dot(sp_ref[...], sw_ref[...], preferred_element_type=jnp.float32)
    h = y_ref[...].astype(jnp.float32) * scale_ref[...] + shift_ref[...] + res
    out_ref[...] = jnp.maximum(h, 0.0).astype(out_ref.dtype)


# --------------------------- pallas_call wrappers ----------------------------

def _conv_with_stats(patches, w, *, tm, y_dtype):
    """Tiled conv matmul (resident weight); returns (y, per-tile sums, sumsqs)."""
    mp, kp = patches.shape
    kp2, cp = w.shape
    assert kp == kp2 and mp % tm == 0 and kp % _LANE == 0 and cp % _LANE == 0
    mt = mp // tm

    in_isz = patches.dtype.itemsize
    y_isz = jnp.dtype(y_dtype).itemsize
    cost = pl.CostEstimate(
        flops=2 * mp * kp * cp,
        transcendentals=0,
        bytes_accessed=int(mp * kp * in_isz            # patch stream (once)
                           + kp * cp * in_isz           # weight (once, resident)
                           + mp * cp * y_isz            # y write
                           + 2 * mt * _SUBLANE * cp * 4))

    return pl.pallas_call(
        _conv_stats_kernel,
        out_shape=(jax.ShapeDtypeStruct((mp, cp), y_dtype),
                   jax.ShapeDtypeStruct((mt * _SUBLANE, cp), jnp.float32),
                   jax.ShapeDtypeStruct((mt * _SUBLANE, cp), jnp.float32)),
        grid_spec=pltpu.PrefetchScalarGridSpec(
            num_scalar_prefetch=0,
            grid=(mt,),
            in_specs=[pl.BlockSpec((tm, kp), lambda i: (i, 0)),
                      # Full-array block, constant block index: fetched once,
                      # stays VMEM-resident for every M tile.
                      pl.BlockSpec((kp, cp), lambda i: (0, 0))],
            out_specs=(pl.BlockSpec((tm, cp), lambda i: (i, 0)),
                       pl.BlockSpec((_SUBLANE, cp), lambda i: (i, 0)),
                       pl.BlockSpec((_SUBLANE, cp), lambda i: (i, 0)))),
        compiler_params=pltpu.CompilerParams(
            # For v7x megacore, prefer mt a multiple of 2 at real shapes.
            dimension_semantics=("parallel",),
            vmem_limit_bytes=_VMEM_LIMIT),
        cost_estimate=cost,
    )(patches, w)


def _bn_finalize(kernel, inputs, in_specs, out_dtype, mp, cp, tm,
                 extra_flops=0):
    """Lane-dense elementwise pass (BN normalize [+ residual] + ReLU)."""
    mt = mp // tm
    bytes_accessed = int(sum(int(a.size) * a.dtype.itemsize for a in inputs)
                         + mp * cp * jnp.dtype(out_dtype).itemsize)
    cost = pl.CostEstimate(flops=3 * mp * cp + extra_flops, transcendentals=0,
                           bytes_accessed=bytes_accessed)
    return pl.pallas_call(
        kernel,
        out_shape=jax.ShapeDtypeStruct((mp, cp), out_dtype),
        grid_spec=pltpu.PrefetchScalarGridSpec(
            num_scalar_prefetch=0,
            grid=(mt,),
            in_specs=in_specs,
            out_specs=pl.BlockSpec((tm, cp), lambda i: (i, 0))),
        compiler_params=pltpu.CompilerParams(
            dimension_semantics=("parallel",),
            vmem_limit_bytes=_VMEM_LIMIT),
        cost_estimate=cost,
    )(*inputs)


# ------------------------------ JAX layout glue -------------------------------

def _im2col(x_nhwc, k, stride):
    """k x k patches with PyTorch 'padding = k // 2' convention."""
    p = k // 2
    xp = jnp.pad(x_nhwc, ((0, 0), (p, p), (p, p), (0, 0)))
    B, Hp, Wp, C = xp.shape
    Ho = (Hp - k) // stride + 1
    Wo = (Wp - k) // stride + 1
    cols = []
    for dh in range(k):
        for dw in range(k):
            cols.append(xp[:, dh:dh + stride * (Ho - 1) + 1:stride,
                            dw:dw + stride * (Wo - 1) + 1:stride, :])
    patches = jnp.concatenate(cols, axis=-1)              # (B, Ho, Wo, k*k*C)
    return patches.reshape(B * Ho * Wo, k * k * C), (B, Ho, Wo)


def _flatten_weight(w_oihw):
    o, i, kh, kw = w_oihw.shape
    return jnp.transpose(w_oihw, (2, 3, 1, 0)).reshape(kh * kw * i, o)


def _pad_matrix(a, rows, cols, dtype):
    a = jnp.pad(a, ((0, rows - a.shape[0]), (0, cols - a.shape[1])))
    return a.astype(dtype)


def _combine_stats(sums, ssqs, m_real, cp):
    s = sums.reshape(-1, _SUBLANE, cp)[:, 0, :].sum(axis=0)
    q = ssqs.reshape(-1, _SUBLANE, cp)[:, 0, :].sum(axis=0)
    mean = s / m_real
    var = q / m_real - mean * mean     # single-pass E[x^2]-E[x]^2, f32 partials
    var = jnp.maximum(var, 0.0)        # guard cancellation -> NaN via rsqrt
    return mean, var


def _bn_scale_shift(mean, var, gamma, beta, cp, eps):
    g = jnp.pad(gamma.astype(jnp.float32), (0, cp - gamma.shape[0]),
                constant_values=1.0)
    b = jnp.pad(beta.astype(jnp.float32), (0, cp - beta.shape[0]))
    scale = g * jax.lax.rsqrt(var + eps)
    shift = b - mean * scale
    return scale.reshape(1, cp), shift.reshape(1, cp)


# ------------------------------ forward pass ----------------------------------

@functools.partial(jax.jit, static_argnames=("stride", "compute_dtype", "tile_m"))
def residual_block_forward(x_nchw, params, *, stride=1,
                           compute_dtype=jnp.bfloat16, tile_m=_TILE_M):
    """Forward pass of ResidualBlock. x_nchw: (B, Cin, H, W), PyTorch layout."""
    conv1_w = params["conv1_w"]            # (Co, Ci, k, k)
    conv2_w = params["conv2_w"]            # (Co, Co, k, k)
    g1, b1 = params["bn1_gamma"], params["bn1_beta"]
    g2, b2 = params["bn2_gamma"], params["bn2_beta"]
    skip_w = params.get("skip_w")          # (Co, Ci, ks, ks) or None (identity)

    Co, Ci, k, _ = conv1_w.shape
    cp = _round_up(Co, _LANE)
    # Cast once up front: im2col patches / skip patches / identity residual are
    # then already in compute_dtype (half-width wrapper traffic on bf16 path).
    x = jnp.transpose(x_nchw, (0, 2, 3, 1)).astype(compute_dtype)    # NHWC

    # ---- conv1 + BN1 batch-stat partials ----
    # TODO(synk): im2col still materialized in HBM (see header).
    p1, (B, Ho, Wo) = _im2col(x, k, stride)
    m = B * Ho * Wo
    mp = _round_up(m, tile_m)
    k1 = _round_up(p1.shape[1], _LANE)
    p1p = _pad_matrix(p1, mp, k1, compute_dtype)
    w1p = _pad_matrix(_flatten_weight(conv1_w), k1, cp, compute_dtype)
    y1, s1, q1 = _conv_with_stats(p1p, w1p, tm=tile_m, y_dtype=compute_dtype)
    # NOTE: padded M rows / K cols of the patches are exactly zero, so they
    # contribute nothing to sum/sumsq; divide by the real M.
    mean1, var1 = _combine_stats(s1, q1, m, cp)
    scale1, shift1 = _bn_scale_shift(mean1, var1, g1, b1, cp, _BN_EPS)

    # ---- BN1 normalize + ReLU ----
    row_spec = pl.BlockSpec((tile_m, cp), lambda i: (i, 0))
    vec_spec = pl.BlockSpec((1, cp), lambda i: (0, 0))
    h1 = _bn_finalize(_bn_relu_kernel, (y1, scale1, shift1),
                      [row_spec, vec_spec, vec_spec],
                      compute_dtype, mp, cp, tile_m)

    # ---- conv2 + BN2 batch-stat partials ----
    h1_nhwc = h1[:m, :Co].reshape(B, Ho, Wo, Co)
    p2, _ = _im2col(h1_nhwc, k, 1)
    k2 = _round_up(p2.shape[1], _LANE)
    p2p = _pad_matrix(p2, mp, k2, compute_dtype)
    w2p = _pad_matrix(_flatten_weight(conv2_w), k2, cp, compute_dtype)
    y2, s2, q2 = _conv_with_stats(p2p, w2p, tm=tile_m, y_dtype=compute_dtype)
    mean2, var2 = _combine_stats(s2, q2, m, cp)
    scale2, shift2 = _bn_scale_shift(mean2, var2, g2, b2, cp, _BN_EPS)

    # ---- BN2 normalize + residual add + ReLU ----
    if skip_w is not None:
        ks = skip_w.shape[2]
        ps, _ = _im2col(x, ks, stride)
        kks = _round_up(ps.shape[1], _LANE)
        psp = _pad_matrix(ps, mp, kks, compute_dtype)
        wsp = _pad_matrix(_flatten_weight(skip_w), kks, cp, compute_dtype)
        out = _bn_finalize(
            _bn_skipconv_add_relu_kernel,
            (y2, scale2, shift2, psp, wsp),
            [row_spec, vec_spec, vec_spec,
             pl.BlockSpec((tile_m, kks), lambda i: (i, 0)),
             pl.BlockSpec((kks, cp), lambda i: (0, 0))],   # resident skip weight
            compute_dtype, mp, cp, tile_m,
            extra_flops=2 * mp * kks * cp)
    else:
        # Identity skip: plain elementwise add (no identity matmul).
        assert stride == 1 and Ci == Co
        res = _pad_matrix(x.reshape(m, Ci), mp, cp, compute_dtype)
        out = _bn_finalize(_bn_add_relu_kernel, (y2, scale2, shift2, res),
                           [row_spec, vec_spec, vec_spec, row_spec],
                           compute_dtype, mp, cp, tile_m)

    out = out[:m, :Co].reshape(B, Ho, Wo, Co)
    return jnp.transpose(out, (0, 3, 1, 2)).astype(x_nchw.dtype)   # NCHW


# --------------------------- pure-JAX reference -------------------------------

def _reference_forward(x, params, *, stride=1, eps=_BN_EPS):
    def conv(x, w, s, p):
        return jax.lax.conv_general_dilated(
            x, w, (s, s), [(p, p), (p, p)],
            dimension_numbers=("NCHW", "OIHW", "NCHW"))

    def bn(x, gamma, beta):
        mean = jnp.mean(x, axis=(0, 2, 3), keepdims=True)
        var = jnp.mean((x - mean) ** 2, axis=(0, 2, 3), keepdims=True)
        return ((x - mean) * jax.lax.rsqrt(var + eps)
                * gamma.reshape(1, -1, 1, 1) + beta.reshape(1, -1, 1, 1))

    k = params["conv1_w"].shape[2]
    if params.get("skip_w") is not None:
        ks = params["skip_w"].shape[2]
        residual = conv(x, params["skip_w"], stride, ks // 2)
    else:
        residual = x
    out = jax.nn.relu(bn(conv(x, params["conv1_w"], stride, k // 2),
                         params["bn1_gamma"], params["bn1_beta"]))
    out = bn(conv(out, params["conv2_w"], 1, k // 2),
             params["bn2_gamma"], params["bn2_beta"])
    return jax.nn.relu(out + residual)


# ---------------------------------- main --------------------------------------

if __name__ == "__main__":
    base_key = jax.random.PRNGKey(0)

    def make_params(keys, cin, cout, k, ks, with_skip):
        return {
            "conv1_w": 0.1 * jax.random.normal(keys[0], (cout, cin, k, k), jnp.float32),
            "conv2_w": 0.1 * jax.random.normal(keys[1], (cout, cout, k, k), jnp.float32),
            "skip_w": (0.1 * jax.random.normal(keys[2], (cout, cin, ks, ks), jnp.float32)
                       if with_skip else None),
            "bn1_gamma": 1.0 + 0.1 * jax.random.normal(keys[3], (cout,), jnp.float32),
            "bn1_beta": 0.1 * jax.random.normal(keys[4], (cout,), jnp.float32),
            "bn2_gamma": 1.0 + 0.1 * jax.random.normal(keys[5], (cout,), jnp.float32),
            "bn2_beta": 0.1 * jax.random.normal(keys[6], (cout,), jnp.float32),
        }

    #           name                  B  Ci Co  H   W  k  ks stride skip?
    configs = [("proj_skip_stride1",  2, 4, 8, 16, 16, 3, 1, 1, True),   # ResidualBlock(4, 8)
               ("identity_skip",      2, 8, 8, 16, 16, 3, 1, 1, False),  # ResidualBlock(8, 8)
               ("proj_skip_stride2",  2, 4, 8, 16, 16, 3, 1, 2, True)]   # ResidualBlock(4, 8, stride=2)

    for idx, (name, B, Cin, Cout, H, W, k, ks, stride, with_skip) in enumerate(configs):
        keys = jax.random.split(jax.random.fold_in(base_key, idx), 8)
        params = make_params(keys, Cin, Cout, k, ks, with_skip)
        x = jax.random.normal(keys[7], (B, Cin, H, W), jnp.float32)

        ref = jax.block_until_ready(_reference_forward(x, params, stride=stride))

        # f32 path: tight numerical check of the kernel math.
        out32 = jax.block_until_ready(
            residual_block_forward(x, params, stride=stride,
                                   compute_dtype=jnp.float32))
        assert out32.shape == ref.shape, (name, out32.shape, ref.shape)
        err32 = float(jnp.max(jnp.abs(out32 - ref)))
        assert jnp.allclose(out32, ref, atol=1e-4, rtol=1e-4), (name, err32)

        # bf16 path (bf16 operands + bf16 y/output, f32 accumulation): the
        # performance configuration; looser sanity tolerance, strict check is
        # the f32 path above.
        out16 = jax.block_until_ready(
            residual_block_forward(x, params, stride=stride,
                                   compute_dtype=jnp.bfloat16))
        err16 = float(jnp.max(jnp.abs(out16 - ref)))
        assert jnp.allclose(out16, ref, atol=1e-1, rtol=1e-1), (name, err16)

    print("KERNEL_OK")
</pallas_src>

<mosaic_0001>
module attributes {stable_mosaic.version = 11 : i64} {
  func.func @_conv_stats_kernel(%arg0: i32, %arg1: memref<512x128xf32, #tpu.memory_space<vmem>>, %arg2: memref<128x128xf32, #tpu.memory_space<vmem>>, %arg3: memref<512x128xf32, #tpu.memory_space<vmem>>, %arg4: memref<8x128xf32, #tpu.memory_space<vmem>>, %arg5: memref<8x128xf32, #tpu.memory_space<vmem>>) attributes {dimension_semantics = [#tpu.dimension_semantics<parallel>], iteration_bounds = array<i64: 1>, scalar_prefetch = 0 : i64, scratch_operands = 0 : i64, tpu.core_type = #tpu.core_type<tc>, window_params = [{transform_indices = @transform_0, window_bounds = array<i64: 512, 128>}, {pipeline_mode = #tpu.pipeline_mode<synchronous>, transform_indices = @transform_1, window_bounds = array<i64: 128, 128>}, {transform_indices = @transform_2, window_bounds = array<i64: 512, 128>}, {transform_indices = @transform_3, window_bounds = array<i64: 8, 128>}, {transform_indices = @transform_4, window_bounds = array<i64: 8, 128>}]} {
    %c0 = arith.constant 0 : index
    %c0_0 = arith.constant 0 : index
    %0 = vector.load %arg1[%c0, %c0_0] : memref<512x128xf32, #tpu.memory_space<vmem>>, vector<512x128xf32>
    %c0_1 = arith.constant 0 : index
    %c0_2 = arith.constant 0 : index
    %1 = vector.load %arg2[%c0_1, %c0_2] : memref<128x128xf32, #tpu.memory_space<vmem>>, vector<128x128xf32>
    %cst = arith.constant dense<0.000000e+00> : vector<512x128xf32>
    %2 = tpu.matmul %0, %1, %cst {dimension_numbers = #tpu.dot_dimension_numbers<[1], [0], [0], [1], [0, 0, 1, 1], [], []>} : vector<512x128xf32>, vector<128x128xf32>, vector<512x128xf32> -> vector<512x128xf32>
    %c0_3 = arith.constant 0 : index
    %c0_4 = arith.constant 0 : index
    %3 = vector.load %arg3[%c0_3, %c0_4] : memref<512x128xf32, #tpu.memory_space<vmem>>, vector<512x128xf32>
    tpu.vector_store %arg3[%c0_3, %c0_4], %2 {strides = array<i32>} : memref<512x128xf32, #tpu.memory_space<vmem>>, vector<512x128xf32>,
    %cst_5 = arith.constant dense<0.000000e+00> : vector<128xf32>
    %4 = vector.multi_reduction <add>, %2, %cst_5 [0] : vector<512x128xf32> to vector<128xf32>
    %5 = vector.shape_cast %4 : vector<128xf32> to vector<1x128xf32>
    %6 = arith.mulf %2, %2 : vector<512x128xf32>
    %cst_6 = arith.constant dense<0.000000e+00> : vector<128xf32>
    %7 = vector.multi_reduction <add>, %6, %cst_6 [0] : vector<512x128xf32> to vector<128xf32>
    %8 = vector.shape_cast %7 : vector<128xf32> to vector<1x128xf32>
    %9 = vector.shape_cast %5 : vector<1x128xf32> to vector<1x128xf32>
    %10 = vector.broadcast %9 : vector<1x128xf32> to vector<8x128xf32>
    %c0_7 = arith.constant 0 : index
    %c0_8 = arith.constant 0 : index
    %11 = vector.load %arg4[%c0_7, %c0_8] : memref<8x128xf32, #tpu.memory_space<vmem>>, vector<8x128xf32>
    tpu.vector_store %arg4[%c0_7, %c0_8], %10 {strides = array<i32>} : memref<8x128xf32, #tpu.memory_space<vmem>>, vector<8x128xf32>,
    %12 = vector.shape_cast %8 : vector<1x128xf32> to vector<1x128xf32>
    %13 = vector.broadcast %12 : vector<1x128xf32> to vector<8x128xf32>
    %c0_9 = arith.constant 0 : index
    %c0_10 = arith.constant 0 : index
    %14 = vector.load %arg5[%c0_9, %c0_10] : memref<8x128xf32, #tpu.memory_space<vmem>>, vector<8x128xf32>
    tpu.vector_store %arg5[%c0_9, %c0_10], %13 {strides = array<i32>} : memref<8x128xf32, #tpu.memory_space<vmem>>, vector<8x128xf32>,
    return
  }
  func.func @transform_0(%arg0: i32) -> (i32, i32) {
    %c0_i32 = arith.constant 0 : i32
    %c0_i32_0 = arith.constant 0 : i32
    return %arg0, %c0_i32 : i32, i32
  }
  func.func @transform_1(%arg0: i32) -> (i32, i32) {
    %c0_i32 = arith.constant 0 : i32
    %c0_i32_0 = arith.constant 0 : i32
    %c0_i32_1 = arith.constant 0 : i32
    return %c0_i32, %c0_i32_0 : i32, i32
  }
  func.func @transform_2(%arg0: i32) -> (i32, i32) {
    %c0_i32 = arith.constant 0 : i32
    %c0_i32_0 = arith.constant 0 : i32
    return %arg0, %c0_i32 : i32, i32
  }
  func.func @transform_3(%arg0: i32) -> (i32, i32) {
    %c0_i32 = arith.constant 0 : i32
    %c0_i32_0 = arith.constant 0 : i32
    return %arg0, %c0_i32 : i32, i32
  }
  func.func @transform_4(%arg0: i32) -> (i32, i32) {
    %c0_i32 = arith.constant 0 : i32
    %c0_i32_0 = arith.constant 0 : i32
    return %arg0, %c0_i32 : i32, i32
  }
}

module attributes {stable_mosaic.version = 11 : i64} {
  func.func @_bn_relu_kernel(%arg0: i32, %arg1: memref<512x128xf32, #tpu.memory_space<vmem>>, %arg2: memref<1x128xf32, #tpu.memory_space<vmem>>, %arg3: memref<1x128xf32, #tpu.memory_space<vmem>>, %arg4: memref<512x128xf32, #tpu.memory_space<vmem>>) attributes {dimension_semantics = [#tpu.dimension_semantics<parallel>], iteration_bounds = array<i64: 1>, scalar_prefetch = 0 : i64, scratch_operands = 0 : i64, tpu.core_type = #tpu.core_type<tc>, window_params = [{transform_indices = @transform_0, window_bounds = array<i64: 512, 128>}, {pipeline_mode = #tpu.pipeline_mode<synchronous>, transform_indices = @transform_1, window_bounds = array<i64: 1, 128>}, {pipeline_mode = #tpu.pipeline_mode<synchronous>, transform_indices = @transform_2, window_bounds = array<i64: 1, 128>}, {transform_indices = @transform_3, window_bounds = array<i64: 512, 128>}]} {
    %c0 = arith.constant 0 : index
    %c0_0 = arith.constant 0 : index
    %0 = vector.load %arg1[%c0, %c0_0] : memref<512x128xf32, #tpu.memory_space<vmem>>, vector<512x128xf32>
    %c0_1 = arith.constant 0 : index
    %c0_2 = arith.constant 0 : index
    %1 = vector.load %arg2[%c0_1, %c0_2] : memref<1x128xf32, #tpu.memory_space<vmem>>, vector<1x128xf32>
    %2 = vector.broadcast %1 : vector<1x128xf32> to vector<512x128xf32>
    %3 = arith.mulf %0, %2 : vector<512x128xf32>
    %c0_3 = arith.constant 0 : index
    %c0_4 = arith.constant 0 : index
    %4 = vector.load %arg3[%c0_3, %c0_4] : memref<1x128xf32, #tpu.memory_space<vmem>>, vector<1x128xf32>
    %5 = vector.broadcast %4 : vector<1x128xf32> to vector<512x128xf32>
    %6 = arith.addf %3, %5 : vector<512x128xf32>
    %cst = arith.constant 0.000000e+00 : f32
    %7 = vector.broadcast %cst : f32 to vector<512x128xf32>
    %8 = arith.maximumf %6, %7 : vector<512x128xf32>
    %c0_5 = arith.constant 0 : index
    %c0_6 = arith.constant 0 : index
    %9 = vector.load %arg4[%c0_5, %c0_6] : memref<512x128xf32, #tpu.memory_space<vmem>>, vector<512x128xf32>
    tpu.vector_store %arg4[%c0_5, %c0_6], %8 {strides = array<i32>} : memref<512x128xf32, #tpu.memory_space<vmem>>, vector<512x128xf32>,
    return
  }
  func.func @transform_0(%arg0: i32) -> (i32, i32) {
    %c0_i32 = arith.constant 0 : i32
    %c0_i32_0 = arith.constant 0 : i32
    return %arg0, %c0_i32 : i32, i32
  }
  func.func @transform_1(%arg0: i32) -> (i32, i32) {
    %c0_i32 = arith.constant 0 : i32
    %c0_i32_0 = arith.constant 0 : i32
    %c0_i32_1 = arith.constant 0 : i32
    return %c0_i32, %c0_i32_0 : i32, i32
  }
  func.func @transform_2(%arg0: i32) -> (i32, i32) {
    %c0_i32 = arith.constant 0 : i32
    %c0_i32_0 = arith.constant 0 : i32
    %c0_i32_1 = arith.constant 0 : i32
    return %c0_i32, %c0_i32_0 : i32, i32
  }
  func.func @transform_3(%arg0: i32) -> (i32, i32) {
    %c0_i32 = arith.constant 0 : i32
    %c0_i32_0 = arith.constant 0 : i32
    return %arg0, %c0_i32 : i32, i32
  }
}

module attributes {stable_mosaic.version = 11 : i64} {
  func.func @_bn_skipconv_add_relu_kernel(%arg0: i32, %arg1: memref<512x128xf32, #tpu.memory_space<vmem>>, %arg2: memref<1x128xf32, #tpu.memory_space<vmem>>, %arg3: memref<1x128xf32, #tpu.memory_space<vmem>>, %arg4: memref<512x128xf32, #tpu.memory_space<vmem>>, %arg5: memref<128x128xf32, #tpu.memory_space<vmem>>, %arg6: memref<512x128xf32, #tpu.memory_space<vmem>>) attributes {dimension_semantics = [#tpu.dimension_semantics<parallel>], iteration_bounds = array<i64: 1>, scalar_prefetch = 0 : i64, scratch_operands = 0 : i64, tpu.core_type = #tpu.core_type<tc>, window_params = [{transform_indices = @transform_0, window_bounds = array<i64: 512, 128>}, {pipeline_mode = #tpu.pipeline_mode<synchronous>, transform_indices = @transform_1, window_bounds = array<i64: 1, 128>}, {pipeline_mode = #tpu.pipeline_mode<synchronous>, transform_indices = @transform_2, window_bounds = array<i64: 1, 128>}, {transform_indices = @transform_3, window_bounds = array<i64: 512, 128>}, {pipeline_mode = #tpu.pipeline_mode<synchronous>, transform_indices = @transform_4, window_bounds = array<i64: 128, 128>}, {transform_indices = @transform_5, window_bounds = array<i64: 512, 128>}]} {
    %c0 = arith.constant 0 : index
    %c0_0 = arith.constant 0 : index
    %0 = vector.load %arg4[%c0, %c0_0] : memref<512x128xf32, #tpu.memory_space<vmem>>, vector<512x128xf32>
    %c0_1 = arith.constant 0 : index
    %c0_2 = arith.constant 0 : index
    %1 = vector.load %arg5[%c0_1, %c0_2] : memref<128x128xf32, #tpu.memory_space<vmem>>, vector<128x128xf32>
    %cst = arith.constant dense<0.000000e+00> : vector<512x128xf32>
    %2 = tpu.matmul %0, %1, %cst {dimension_numbers = #tpu.dot_dimension_numbers<[1], [0], [0], [1], [0, 0, 1, 1], [], []>} : vector<512x128xf32>, vector<128x128xf32>, vector<512x128xf32> -> vector<512x128xf32>
    %c0_3 = arith.constant 0 : index
    %c0_4 = arith.constant 0 : index
    %3 = vector.load %arg1[%c0_3, %c0_4] : memref<512x128xf32, #tpu.memory_space<vmem>>, vector<512x128xf32>
    %c0_5 = arith.constant 0 : index
    %c0_6 = arith.constant 0 : index
    %4 = vector.load %arg2[%c0_5, %c0_6] : memref<1x128xf32, #tpu.memory_space<vmem>>, vector<1x128xf32>
    %5 = vector.broadcast %4 : vector<1x128xf32> to vector<512x128xf32>
    %6 = arith.mulf %3, %5 : vector<512x128xf32>
    %c0_7 = arith.constant 0 : index
    %c0_8 = arith.constant 0 : index
    %7 = vector.load %arg3[%c0_7, %c0_8] : memref<1x128xf32, #tpu.memory_space<vmem>>, vector<1x128xf32>
    %8 = vector.broadcast %7 : vector<1x128xf32> to vector<512x128xf32>
    %9 = arith.addf %6, %8 : vector<512x128xf32>
    %10 = arith.addf %9, %2 : vector<512x128xf32>
    %cst_9 = arith.constant 0.000000e+00 : f32
    %11 = vector.broadcast %cst_9 : f32 to vector<512x128xf32>
    %12 = arith.maximumf %10, %11 : vector<512x128xf32>
    %c0_10 = arith.constant 0 : index
    %c0_11 = arith.constant 0 : index
    %13 = vector.load %arg6[%c0_10, %c0_11] : memref<512x128xf32, #tpu.memory_space<vmem>>, vector<512x128xf32>
    tpu.vector_store %arg6[%c0_10, %c0_11], %12 {strides = array<i32>} : memref<512x128xf32, #tpu.memory_space<vmem>>, vector<512x128xf32>,
    return
  }
  func.func @transform_0(%arg0: i32) -> (i32, i32) {
    %c0_i32 = arith.constant 0 : i32
    %c0_i32_0 = arith.constant 0 : i32
    return %arg0, %c0_i32 : i32, i32
  }
  func.func @transform_1(%arg0: i32) -> (i32, i32) {
    %c0_i32 = arith.constant 0 : i32
    %c0_i32_0 = arith.constant 0 : i32
    %c0_i32_1 = arith.constant 0 : i32
    return %c0_i32, %c0_i32_0 : i32, i32
  }
  func.func @transform_2(%arg0: i32) -> (i32, i32) {
    %c0_i32 = arith.constant 0 : i32
    %c0_i32_0 = arith.constant 0 : i32
    %c0_i32_1 = arith.constant 0 : i32
    return %c0_i32, %c0_i32_0 : i32, i32
  }
  func.func @transform_3(%arg0: i32) -> (i32, i32) {
    %c0_i32 = arith.constant 0 : i32
    %c0_i32_0 = arith.constant 0 : i32
    return %arg0, %c0_i32 : i32, i32
  }
  func.func @transform_4(%arg0: i32) -> (i32, i32) {
    %c0_i32 = arith.constant 0 : i32
    %c0_i32_0 = arith.constant 0 : i32
    %c0_i32_1 = arith.constant 0 : i32
    return %c0_i32, %c0_i32_0 : i32, i32
  }
  func.func @transform_5(%arg0: i32) -> (i32, i32) {
    %c0_i32 = arith.constant 0 : i32
    %c0_i32_0 = arith.constant 0 : i32
    return %arg0, %c0_i32 : i32, i32
  }
}

</mosaic_0001>

<bundles_post_ra>
// kernel: residual_block_forward.5
= control target key start
LH: loop header
LB: loop body
LE: loop exit
PB: predicated region body
PF: predicated region fallthrough
CT: control target
= control target key end

     0   :  { %s896_s0 = inlined_call_operand.vmem [shape: f32[512,128], index: 0, kind: input, shape index: {}]   ;;  %s897_s1 = inlined_call_operand.vmem [shape: f32[1,128], index: 1, kind: input, shape index: {}]   ;;  %s898_s2 = inlined_call_operand.vmem [shape: f32[1,128], index: 2, kind: input, shape index: {}]   ;;  %s899_s3 = inlined_call_operand.vmem [shape: f32[512,128], index: 3, kind: output, shape index: {}]  }
   0x1   :  { %v14_v0 = vld [vmem:[%s896_s0] sm:$0xff]  ;;  %v15_v4 = vld [vmem:[%s896_s0 + $0x8] sm:$0xff]  ;;  %v16_v5 = vld [vmem:[%s896_s0 + $0x10] sm:$0xff] }
   0x2   :  { %v380_v1 = vld [vmem:[%s897_s1] ss:$0 sm:$0xff]  ;;  %v17_v6 = vld [vmem:[%s896_s0 + $0x18] sm:$0xff]  ;;  %v19_v11 = vld [vmem:[%s896_s0 + $0x28] sm:$0xff] }
   0x3   :  { %v385_v2 = vld [vmem:[%s898_s2] ss:$0 sm:$0xff]  ;;  %v85_v3 = vmul.f32 %v380_v1, %v14_v0  ;;  %v86_v7 = vmul.f32 %v380_v1, %v15_v4  ;;  %v87_v8 = vmul.f32 %v380_v1, %v16_v5  ;;  %v88_v9 = vmul.f32 %v380_v1, %v17_v6  ;;  %v20_v12 = vld [vmem:[%s896_s0 + $0x30] sm:$0xff]  ;;  %v21_v17 = vld [vmem:[%s896_s0 + $0x38] sm:$0xff] }
   0x4   :  { %v18_v10 = vld [vmem:[%s896_s0 + $0x20] sm:$0xff]  ;;  %v90_v15 = vmul.f32 %v380_v1, %v19_v11  ;;  %v91_v16 = vmul.f32 %v380_v1, %v20_v12  ;;  %v92_v21 = vmul.f32 %v380_v1, %v21_v17  ;;  %v23_v27 = vld [vmem:[%s896_s0 + $0x48] sm:$0xff]  ;;  %v24_v28 = vld [vmem:[%s896_s0 + $0x50] sm:$0xff] }
   0x5   :  { %v156_v13 = vadd.f32 %v385_v2, %v85_v3  ;;  %v89_v14 = vmul.f32 %v380_v1, %v18_v10  ;;  %v157_v18 = vadd.f32 %v385_v2, %v86_v7  ;;  %v158_v19 = vadd.f32 %v385_v2, %v87_v8  ;;  %v22_v22 = vld [vmem:[%s896_s0 + $0x40] sm:$0xff]  ;;  %v25_v29 = vld [vmem:[%s896_s0 + $0x58] sm:$0xff]  ;;  %v27_v35 = vld [vmem:[%s896_s0 + $0x68] sm:$0xff] }
   0x6   :  { %v159_v20 = vadd.f32 %v385_v2, %v88_v9  ;;  %v161_v25 = vadd.f32 %v385_v2, %v90_v15  ;;  %v162_v26 = vadd.f32 %v385_v2, %v91_v16  ;;  %v163_v33 = vadd.f32 %v385_v2, %v92_v21  ;;  %v26_v34 = vld [vmem:[%s896_s0 + $0x60] sm:$0xff]  ;;  %v28_v36 = vld [vmem:[%s896_s0 + $0x70] sm:$0xff]  ;;  %v29_v41 = vld [vmem:[%s896_s0 + $0x78] sm:$0xff] }
   0x7   :  { %v220_v23 = vmax.f32 %v156_v13, 0.0  ;;  %v160_v24 = vadd.f32 %v385_v2, %v89_v14  ;;  %v221_v30 = vmax.f32 %v157_v18, 0.0  ;;  %v222_v31 = vmax.f32 %v158_v19, 0.0  ;;  %v30_v54 = vld [vmem:[%s896_s0 + $0x80] sm:$0xff]  ;;  %v31_v59 = vld [vmem:[%s896_s0 + $0x88] sm:$0xff]  ;;  %v32_v60 = vld [vmem:[%s896_s0 + $0x90] sm:$0xff] }
   0x8   :  { %v223_v32 = vmax.f32 %v159_v20, 0.0  ;;  %v225_v38 = vmax.f32 %v161_v25, 0.0  ;;  %v226_v39 = vmax.f32 %v162_v26, 0.0  ;;  %v93_v40 = vmul.f32 %v380_v1, %v22_v22  ;;  %v33_v61 = vld [vmem:[%s896_s0 + $0x98] sm:$0xff]  ;;  %v34_v4 = vld [vmem:[%s896_s0 + $0xa0] sm:$0xff]  ;;  %v35_v5 = vld [vmem:[%s896_s0 + $0xa8] sm:$0xff] }
   0x9   :  { %284 = vst [vmem:[%s899_s3] sm:$0xff] %v220_v23  ;;  %v224_v37 = vmax.f32 %v160_v24, 0.0  ;;  %285 = vst [vmem:[%s899_s3 + $0x8] sm:$0xff] %v221_v30  ;;  %v227_v42 = vmax.f32 %v163_v33, 0.0  ;;  %v94_v43 = vmul.f32 %v380_v1, %v23_v27  ;;  %v95_v44 = vmul.f32 %v380_v1, %v24_v28  ;;  %v36_v6 = vld [vmem:[%s896_s0 + $0xb0] sm:$0xff]  ;;  %v37_v11 = vld [vmem:[%s896_s0 + $0xb8] sm:$0xff] }
   0xa   :  { %286 = vst [vmem:[%s899_s3 + $0x10] sm:$0xff] %v222_v31  ;;  %287 = vst [vmem:[%s899_s3 + $0x18] sm:$0xff] %v223_v32  ;;  %v96_v45 = vmul.f32 %v380_v1, %v25_v29  ;;  %v164_v46 = vadd.f32 %v385_v2, %v93_v40  ;;  %v97_v47 = vmul.f32 %v380_v1, %v26_v34  ;;  %v38_v24 = vld [vmem:[%s896_s0 + $0xc0] sm:$0xff]  ;;  %v39_v29 = vld [vmem:[%s896_s0 + $0xc8] sm:$0xff] }
   0xb   :  { %288 = vst [vmem:[%s899_s3 + $0x20] sm:$0xff] %v224_v37  ;;  %289 = vst [vmem:[%s899_s3 + $0x28] sm:$0xff] %v225_v38  ;;  %v98_v48 = vmul.f32 %v380_v1, %v27_v35  ;;  %v99_v49 = vmul.f32 %v380_v1, %v28_v36  ;;  %v165_v50 = vadd.f32 %v385_v2, %v94_v43  ;;  %v40_v30 = vld [vmem:[%s896_s0 + $0xd0] sm:$0xff]  ;;  %v41_v31 = vld [vmem:[%s896_s0 + $0xd8] sm:$0xff] }
   0xc   :  { %290 = vst [vmem:[%s899_s3 + $0x30] sm:$0xff] %v226_v39  ;;  %291 = vst [vmem:[%s899_s3 + $0x38] sm:$0xff] %v227_v42  ;;  %v166_v51 = vadd.f32 %v385_v2, %v95_v44  ;;  %v167_v52 = vadd.f32 %v385_v2, %v96_v45  ;;  %v100_v53 = vmul.f32 %v380_v1, %v29_v41  ;;  %v228_v55 = vmax.f32 %v164_v46, 0.0  ;;  %v42_v36 = vld [vmem:[%s896_s0 + $0xe0] sm:$0xff]  ;;  %v43_v37 = vld [vmem:[%s896_s0 + $0xe8] sm:$0xff] }
   0xd   :  { %v168_v56 = vadd.f32 %v385_v2, %v97_v47  ;;  %v169_v57 = vadd.f32 %v385_v2, %v98_v48  ;;  %v170_v58 = vadd.f32 %v385_v2, %v99_v49  ;;  %v229_v62 = vmax.f32 %v165_v50, 0.0  ;;  %v44_v38 = vld [vmem:[%s896_s0 + $0xf0] sm:$0xff]  ;;  %v45_v43 = vld [vmem:[%s896_s0 + $0xf8] sm:$0xff] }
   0xe   :  { %v230_v63 = vmax.f32 %v166_v51, 0.0  ;;  %v231_v0 = vmax.f32 %v167_v52, 0.0  ;;  %v171_v3 = vadd.f32 %v385_v2, %v100_v53  ;;  %292 = vst [vmem:[%s899_s3 + $0x40] sm:$0xff] %v228_v55  ;;  %v101_v10 = vmul.f32 %v380_v1, %v30_v54 }
   0xf   :  { %v232_v7 = vmax.f32 %v168_v56, 0.0  ;;  %v233_v8 = vmax.f32 %v169_v57, 0.0  ;;  %v234_v9 = vmax.f32 %v170_v58, 0.0  ;;  %293 = vst [vmem:[%s899_s3 + $0x48] sm:$0xff] %v229_v62  ;;  %v102_v13 = vmul.f32 %v380_v1, %v31_v59  ;;  %v46_v56 = vld [vmem:[%s896_s0 + $0x100] sm:$0xff]  ;;  %v48_v62 = vld [vmem:[%s896_s0 + $0x110] sm:$0xff] }
  0x10   :  { %294 = vst [vmem:[%s899_s3 + $0x50] sm:$0xff] %v230_v63  ;;  %295 = vst [vmem:[%s899_s3 + $0x58] sm:$0xff] %v231_v0  ;;  %v235_v12 = vmax.f32 %v171_v3, 0.0  ;;  %v103_v14 = vmul.f32 %v380_v1, %v32_v60  ;;  %v104_v15 = vmul.f32 %v380_v1, %v33_v61  ;;  %v172_v16 = vadd.f32 %v385_v2, %v101_v10  ;;  %v47_v61 = vld [vmem:[%s896_s0 + $0x108] sm:$0xff]  ;;  %v49_v63 = vld [vmem:[%s896_s0 + $0x118] sm:$0xff] }
  0x11   :  { %296 = vst [vmem:[%s899_s3 + $0x60] sm:$0xff] %v232_v7  ;;  %297 = vst [vmem:[%s899_s3 + $0x68] sm:$0xff] %v233_v8  ;;  %v105_v17 = vmul.f32 %v380_v1, %v34_v4  ;;  %v106_v18 = vmul.f32 %v380_v1, %v35_v5  ;;  %v107_v19 = vmul.f32 %v380_v1, %v36_v6  ;;  %v50_v6 = vld [vmem:[%s896_s0 + $0x120] sm:$0xff]  ;;  %v51_v7 = vld [vmem:[%s896_s0 + $0x128] sm:$0xff] }
  0x12   :  { %298 = vst [vmem:[%s899_s3 + $0x70] sm:$0xff] %v234_v9  ;;  %299 = vst [vmem:[%s899_s3 + $0x78] sm:$0xff] %v235_v12  ;;  %v173_v20 = vadd.f32 %v385_v2, %v102_v13  ;;  %v174_v21 = vadd.f32 %v385_v2, %v103_v14  ;;  %v175_v22 = vadd.f32 %v385_v2, %v104_v15  ;;  %v236_v25 = vmax.f32 %v172_v16, 0.0  ;;  %v52_v8 = vld [vmem:[%s896_s0 + $0x130] sm:$0xff]  ;;  %v53_v13 = vld [vmem:[%s896_s0 + $0x138] sm:$0xff] }
  0x13   :  { %v108_v23 = vmul.f32 %v380_v1, %v37_v11  ;;  %v176_v26 = vadd.f32 %v385_v2, %v105_v17  ;;  %v177_v27 = vadd.f32 %v385_v2, %v106_v18  ;;  %v178_v28 = vadd.f32 %v385_v2, %v107_v19 }
  0x14   :  { %v237_v32 = vmax.f32 %v173_v20, 0.0  ;;  %v238_v33 = vmax.f32 %v174_v21, 0.0  ;;  %v239_v34 = vmax.f32 %v175_v22, 0.0  ;;  %300 = vst [vmem:[%s899_s3 + $0x80] sm:$0xff] %v236_v25  ;;  %v109_v42 = vmul.f32 %v380_v1, %v38_v24 }
  0x15   :  { %v179_v35 = vadd.f32 %v385_v2, %v108_v23  ;;  %v240_v39 = vmax.f32 %v176_v26, 0.0  ;;  %v241_v40 = vmax.f32 %v177_v27, 0.0  ;;  %v242_v41 = vmax.f32 %v178_v28, 0.0  ;;  %v54_v26 = vld [vmem:[%s896_s0 + $0x140] sm:$0xff] }
  0x16   :  { %301 = vst [vmem:[%s899_s3 + $0x88] sm:$0xff] %v237_v32  ;;  %302 = vst [vmem:[%s899_s3 + $0x90] sm:$0xff] %v238_v33  ;;  %v110_v45 = vmul.f32 %v380_v1, %v39_v29  ;;  %v111_v46 = vmul.f32 %v380_v1, %v40_v30  ;;  %v112_v47 = vmul.f32 %v380_v1, %v41_v31  ;;  %v55_v31 = vld [vmem:[%s896_s0 + $0x148] sm:$0xff]  ;;  %v56_v32 = vld [vmem:[%s896_s0 + $0x150] sm:$0xff] }
  0x17   :  { %303 = vst [vmem:[%s899_s3 + $0x98] sm:$0xff] %v239_v34  ;;  %v243_v44 = vmax.f32 %v179_v35, 0.0  ;;  %304 = vst [vmem:[%s899_s3 + $0xa0] sm:$0xff] %v240_v39  ;;  %v180_v48 = vadd.f32 %v385_v2, %v109_v42  ;;  %v113_v49 = vmul.f32 %v380_v1, %v42_v36  ;;  %v114_v50 = vmul.f32 %v380_v1, %v43_v37  ;;  %v57_v33 = vld [vmem:[%s896_s0 + $0x158] sm:$0xff]  ;;  %v59_v39 = vld [vmem:[%s896_s0 + $0x168] sm:$0xff] }
  0x18   :  { %305 = vst [vmem:[%s899_s3 + $0xa8] sm:$0xff] %v241_v40  ;;  %306 = vst [vmem:[%s899_s3 + $0xb0] sm:$0xff] %v242_v41  ;;  %v115_v51 = vmul.f32 %v380_v1, %v44_v38  ;;  %v181_v52 = vadd.f32 %v385_v2, %v110_v45  ;;  %v182_v53 = vadd.f32 %v385_v2, %v111_v46  ;;  %v58_v38 = vld [vmem:[%s896_s0 + $0x160] sm:$0xff]  ;;  %v60_v40 = vld [vmem:[%s896_s0 + $0x170] sm:$0xff] }
  0x19   :  { %307 = vst [vmem:[%s899_s3 + $0xb8] sm:$0xff] %v243_v44  ;;  %v183_v54 = vadd.f32 %v385_v2, %v112_v47  ;;  %v116_v55 = vmul.f32 %v380_v1, %v45_v43  ;;  %v244_v57 = vmax.f32 %v180_v48, 0.0  ;;  %v184_v58 = vadd.f32 %v385_v2, %v113_v49  ;;  %v61_v45 = vld [vmem:[%s896_s0 + $0x178] sm:$0xff] }
  0x1a   :  { %v185_v59 = vadd.f32 %v385_v2, %v114_v50  ;;  %v186_v60 = vadd.f32 %v385_v2, %v115_v51  ;;  %v245_v0 = vmax.f32 %v181_v52, 0.0  ;;  %v246_v3 = vmax.f32 %v182_v53, 0.0 }
  0x1b   :  { %v247_v4 = vmax.f32 %v183_v54, 0.0  ;;  %v187_v5 = vadd.f32 %v385_v2, %v116_v55  ;;  %308 = vst [vmem:[%s899_s3 + $0xc0] sm:$0xff] %v244_v57  ;;  %v248_v9 = vmax.f32 %v184_v58, 0.0  ;;  %v117_v12 = vmul.f32 %v380_v1, %v46_v56  ;;  %v62_v58 = vld [vmem:[%s896_s0 + $0x180] sm:$0xff] }
  0x1c   :  { %v249_v10 = vmax.f32 %v185_v59, 0.0  ;;  %v250_v11 = vmax.f32 %v186_v60, 0.0  ;;  %309 = vst [vmem:[%s899_s3 + $0xc8] sm:$0xff] %v245_v0  ;;  %310 = vst [vmem:[%s899_s3 + $0xd0] sm:$0xff] %v246_v3  ;;  %v118_v15 = vmul.f32 %v380_v1, %v47_v61  ;;  %v119_v16 = vmul.f32 %v380_v1, %v48_v62  ;;  %v64_v0 = vld [vmem:[%s896_s0 + $0x190] sm:$0xff]  ;;  %v65_v3 = vld [vmem:[%s896_s0 + $0x198] sm:$0xff] }
  0x1d   :  { %311 = vst [vmem:[%s899_s3 + $0xd8] sm:$0xff] %v247_v4  ;;  %v251_v14 = vmax.f32 %v187_v5, 0.0  ;;  %v120_v17 = vmul.f32 %v380_v1, %v49_v63  ;;  %312 = vst [vmem:[%s899_s3 + $0xe0] sm:$0xff] %v248_v9  ;;  %v188_v18 = vadd.f32 %v385_v2, %v117_v12  ;;  %v121_v19 = vmul.f32 %v380_v1, %v50_v6  ;;  %v63_v63 = vld [vmem:[%s896_s0 + $0x188] sm:$0xff] }
  0x1e   :  { %313 = vst [vmem:[%s899_s3 + $0xe8] sm:$0xff] %v249_v10  ;;  %314 = vst [vmem:[%s899_s3 + $0xf0] sm:$0xff] %v250_v11  ;;  %v122_v20 = vmul.f32 %v380_v1, %v51_v7  ;;  %v123_v21 = vmul.f32 %v380_v1, %v52_v8  ;;  %v189_v22 = vadd.f32 %v385_v2, %v118_v15  ;;  %v66_v8 = vld [vmem:[%s896_s0 + $0x1a0] sm:$0xff]  ;;  %v67_v9 = vld [vmem:[%s896_s0 + $0x1a8] sm:$0xff] }
  0x1f   :  { %315 = vst [vmem:[%s899_s3 + $0xf8] sm:$0xff] %v251_v14  ;;  %v190_v23 = vadd.f32 %v385_v2, %v119_v16  ;;  %v191_v24 = vadd.f32 %v385_v2, %v120_v17  ;;  %v124_v25 = vmul.f32 %v380_v1, %v53_v13  ;;  %v252_v27 = vmax.f32 %v188_v18, 0.0  ;;  %v68_v10 = vld [vmem:[%s896_s0 + $0x1b0] sm:$0xff]  ;;  %v69_v15 = vld [vmem:[%s896_s0 + $0x1b8] sm:$0xff] }
  0x20   :  { %v192_v28 = vadd.f32 %v385_v2, %v121_v19  ;;  %v193_v29 = vadd.f32 %v385_v2, %v122_v20  ;;  %v194_v30 = vadd.f32 %v385_v2, %v123_v21  ;;  %v253_v34 = vmax.f32 %v189_v22, 0.0 }
  0x21   :  { %v254_v35 = vmax.f32 %v190_v23, 0.0  ;;  %v255_v36 = vmax.f32 %v191_v24, 0.0  ;;  %v195_v37 = vadd.f32 %v385_v2, %v124_v25  ;;  %316 = vst [vmem:[%s899_s3 + $0x100] sm:$0xff] %v252_v27  ;;  %v125_v44 = vmul.f32 %v380_v1, %v54_v26 }
  0x22   :  { %v256_v41 = vmax.f32 %v192_v28, 0.0  ;;  %v257_v42 = vmax.f32 %v193_v29, 0.0  ;;  %v258_v43 = vmax.f32 %v194_v30, 0.0  ;;  %317 = vst [vmem:[%s899_s3 + $0x108] sm:$0xff] %v253_v34  ;;  %v126_v47 = vmul.f32 %v380_v1, %v55_v31  ;;  %v70_v28 = vld [vmem:[%s896_s0 + $0x1c0] sm:$0xff]  ;;  %v72_v34 = vld [vmem:[%s896_s0 + $0x1d0] sm:$0xff] }
  0x23   :  { %318 = vst [vmem:[%s899_s3 + $0x110] sm:$0xff] %v254_v35  ;;  %319 = vst [vmem:[%s899_s3 + $0x118] sm:$0xff] %v255_v36  ;;  %v259_v46 = vmax.f32 %v195_v37, 0.0  ;;  %v127_v48 = vmul.f32 %v380_v1, %v56_v32  ;;  %v128_v49 = vmul.f32 %v380_v1, %v57_v33  ;;  %v196_v50 = vadd.f32 %v385_v2, %v125_v44  ;;  %v71_v33 = vld [vmem:[%s896_s0 + $0x1c8] sm:$0xff]  ;;  %v73_v35 = vld [vmem:[%s896_s0 + $0x1d8] sm:$0xff] }
  0x24   :  { %320 = vst [vmem:[%s899_s3 + $0x120] sm:$0xff] %v256_v41  ;;  %321 = vst [vmem:[%s899_s3 + $0x128] sm:$0xff] %v257_v42  ;;  %v129_v51 = vmul.f32 %v380_v1, %v58_v38  ;;  %v130_v52 = vmul.f32 %v380_v1, %v59_v39  ;;  %v131_v53 = vmul.f32 %v380_v1, %v60_v40  ;;  %v74_v40 = vld [vmem:[%s896_s0 + $0x1e0] sm:$0xff]  ;;  %v75_v41 = vld [vmem:[%s896_s0 + $0x1e8] sm:$0xff] }
  0x25   :  { %322 = vst [vmem:[%s899_s3 + $0x130] sm:$0xff] %v258_v43  ;;  %323 = vst [vmem:[%s899_s3 + $0x138] sm:$0xff] %v259_v46  ;;  %v197_v54 = vadd.f32 %v385_v2, %v126_v47  ;;  %v198_v55 = vadd.f32 %v385_v2, %v127_v48  ;;  %v199_v56 = vadd.f32 %v385_v2, %v128_v49  ;;  %v260_v59 = vmax.f32 %v196_v50, 0.0  ;;  %v76_v42 = vld [vmem:[%s896_s0 + $0x1f0] sm:$0xff]  ;;  %v77_v47 = vld [vmem:[%s896_s0 + $0x1f8] sm:$0xff] }
  0x26   :  { %v132_v57 = vmul.f32 %v380_v1, %v61_v45  ;;  %v200_v60 = vadd.f32 %v385_v2, %v129_v51  ;;  %v201_v61 = vadd.f32 %v385_v2, %v130_v52  ;;  %v202_v62 = vadd.f32 %v385_v2, %v131_v53 }
  0x27   :  { %v261_v4 = vmax.f32 %v197_v54, 0.0  ;;  %v262_v5 = vmax.f32 %v198_v55, 0.0  ;;  %v263_v6 = vmax.f32 %v199_v56, 0.0  ;;  %324 = vst [vmem:[%s899_s3 + $0x140] sm:$0xff] %v260_v59  ;;  %v133_v14 = vmul.f32 %v380_v1, %v62_v58 }
  0x28   :  { %v203_v7 = vadd.f32 %v385_v2, %v132_v57  ;;  %v264_v11 = vmax.f32 %v200_v60, 0.0  ;;  %v265_v12 = vmax.f32 %v201_v61, 0.0  ;;  %v266_v13 = vmax.f32 %v202_v62, 0.0 }
  0x29   :  { %325 = vst [vmem:[%s899_s3 + $0x148] sm:$0xff] %v261_v4  ;;  %326 = vst [vmem:[%s899_s3 + $0x150] sm:$0xff] %v262_v5  ;;  %v134_v17 = vmul.f32 %v380_v1, %v63_v63  ;;  %v135_v18 = vmul.f32 %v380_v1, %v64_v0  ;;  %v136_v19 = vmul.f32 %v380_v1, %v65_v3 }
  0x2a   :  { %327 = vst [vmem:[%s899_s3 + $0x158] sm:$0xff] %v263_v6  ;;  %v267_v16 = vmax.f32 %v203_v7, 0.0  ;;  %328 = vst [vmem:[%s899_s3 + $0x160] sm:$0xff] %v264_v11  ;;  %v204_v20 = vadd.f32 %v385_v2, %v133_v14  ;;  %v137_v21 = vmul.f32 %v380_v1, %v66_v8  ;;  %v138_v22 = vmul.f32 %v380_v1, %v67_v9 }
  0x2b   :  { %329 = vst [vmem:[%s899_s3 + $0x168] sm:$0xff] %v265_v12  ;;  %330 = vst [vmem:[%s899_s3 + $0x170] sm:$0xff] %v266_v13  ;;  %v139_v23 = vmul.f32 %v380_v1, %v68_v10  ;;  %v205_v24 = vadd.f32 %v385_v2, %v134_v17  ;;  %v206_v25 = vadd.f32 %v385_v2, %v135_v18 }
  0x2c   :  { %331 = vst [vmem:[%s899_s3 + $0x178] sm:$0xff] %v267_v16  ;;  %v207_v26 = vadd.f32 %v385_v2, %v136_v19  ;;  %v140_v27 = vmul.f32 %v380_v1, %v69_v15  ;;  %v268_v29 = vmax.f32 %v204_v20, 0.0  ;;  %v208_v30 = vadd.f32 %v385_v2, %v137_v21 }
  0x2d   :  { %v209_v31 = vadd.f32 %v385_v2, %v138_v22  ;;  %v210_v32 = vadd.f32 %v385_v2, %v139_v23  ;;  %v269_v36 = vmax.f32 %v205_v24, 0.0  ;;  %v270_v37 = vmax.f32 %v206_v25, 0.0 }
  0x2e   :  { %v271_v38 = vmax.f32 %v207_v26, 0.0  ;;  %v211_v39 = vadd.f32 %v385_v2, %v140_v27  ;;  %332 = vst [vmem:[%s899_s3 + $0x180] sm:$0xff] %v268_v29  ;;  %v272_v43 = vmax.f32 %v208_v30, 0.0  ;;  %v141_v46 = vmul.f32 %v380_v1, %v70_v28 }
  0x2f   :  { %v273_v44 = vmax.f32 %v209_v31, 0.0  ;;  %v274_v45 = vmax.f32 %v210_v32, 0.0  ;;  %333 = vst [vmem:[%s899_s3 + $0x188] sm:$0xff] %v269_v36  ;;  %334 = vst [vmem:[%s899_s3 + $0x190] sm:$0xff] %v270_v37  ;;  %v142_v49 = vmul.f32 %v380_v1, %v71_v33  ;;  %v143_v50 = vmul.f32 %v380_v1, %v72_v34 }
  0x30   :  { %335 = vst [vmem:[%s899_s3 + $0x198] sm:$0xff] %v271_v38  ;;  %v275_v48 = vmax.f32 %v211_v39, 0.0  ;;  %v144_v51 = vmul.f32 %v380_v1, %v73_v35  ;;  %336 = vst [vmem:[%s899_s3 + $0x1a0] sm:$0xff] %v272_v43  ;;  %v212_v52 = vadd.f32 %v385_v2, %v141_v46  ;;  %v145_v53 = vmul.f32 %v380_v1, %v74_v40 }
  0x31   :  { %337 = vst [vmem:[%s899_s3 + $0x1a8] sm:$0xff] %v273_v44  ;;  %338 = vst [vmem:[%s899_s3 + $0x1b0] sm:$0xff] %v274_v45  ;;  %v146_v54 = vmul.f32 %v380_v1, %v75_v41  ;;  %v147_v55 = vmul.f32 %v380_v1, %v76_v42  ;;  %v213_v56 = vadd.f32 %v385_v2, %v142_v49 }
  0x32   :  { %339 = vst [vmem:[%s899_s3 + $0x1b8] sm:$0xff] %v275_v48  ;;  %v214_v57 = vadd.f32 %v385_v2, %v143_v50  ;;  %v215_v58 = vadd.f32 %v385_v2, %v144_v51  ;;  %v148_v59 = vmul.f32 %v380_v1, %v77_v47  ;;  %v276_v60 = vmax.f32 %v212_v52, 0.0 }
  0x33   :  { %v216_v61 = vadd.f32 %v385_v2, %v145_v53  ;;  %v217_v62 = vadd.f32 %v385_v2, %v146_v54  ;;  %v218_v63 = vadd.f32 %v385_v2, %v147_v55  ;;  %v277_v0 = vmax.f32 %v213_v56, 0.0 }
  0x34   :  { %v278_v3 = vmax.f32 %v214_v57, 0.0  ;;  %v279_v4 = vmax.f32 %v215_v58, 0.0  ;;  %v219_v5 = vadd.f32 %v385_v2, %v148_v59  ;;  %340 = vst [vmem:[%s899_s3 + $0x1c0] sm:$0xff] %v276_v60 }
  0x35   :  { %v280_v6 = vmax.f32 %v216_v61, 0.0  ;;  %v281_v7 = vmax.f32 %v217_v62, 0.0  ;;  %v282_v8 = vmax.f32 %v218_v63, 0.0  ;;  %341 = vst [vmem:[%s899_s3 + $0x1c8] sm:$0xff] %v277_v0 }
  0x36   :  { %342 = vst [vmem:[%s899_s3 + $0x1d0] sm:$0xff] %v278_v3  ;;  %343 = vst [vmem:[%s899_s3 + $0x1d8] sm:$0xff] %v279_v4  ;;  %v283_v1 = vmax.f32 %v219_v5, 0.0 }
  0x37   :  { %344 = vst [vmem:[%s899_s3 + $0x1e0] sm:$0xff] %v280_v6  ;;  %345 = vst [vmem:[%s899_s3 + $0x1e8] sm:$0xff] %v281_v7 }
  0x38   :  { %346 = vst [vmem:[%s899_s3 + $0x1f0] sm:$0xff] %v282_v8  ;;  %347 = vst [vmem:[%s899_s3 + $0x1f8] sm:$0xff] %v283_v1 }

// kernel: residual_block_forward.4
= control target key start
LH: loop header
LB: loop body
LE: loop exit
PB: predicated region body
PF: predicated region fallthrough
CT: control target
= control target key end

     0   :  { %s1670_s1 = inlined_call_operand.vmem [shape: f32[128,128], index: 1, kind: input, shape index: {}]   ;;  %s1671_s0 = inlined_call_operand.vmem [shape: f32[512,128], index: 0, kind: input, shape index: {}]   ;;  %s1672_s2 = inlined_call_operand.vmem [shape: f32[512,128], index: 2, kind: output, shape index: {0}]   ;;  %s1673_s3 = inlined_call_operand.vmem [shape: f32[8,128], index: 3, kind: output, shape index: {1}]   ;;  %s1674_s4 = inlined_call_operand.vmem [shape: f32[8,128], index: 4, kind: output, shape index: {2}]  }
   0x1   :  { %v78_v0 = vld [vmem:[%s1670_s1] sm:$0xff]  ;;  %v79_v1 = vld [vmem:[%s1670_s1 + $0x8] sm:$0xff]  ;;  %v80_v2 = vld [vmem:[%s1670_s1 + $0x10] sm:$0xff] }
   0x2   :  { %v967_v3 = vpack.c.bf16 %v79_v1, %v78_v0  ;;  %v81_v4 = vld [vmem:[%s1670_s1 + $0x18] sm:$0xff]  ;;  %v82_v6 = vld [vmem:[%s1670_s1 + $0x20] sm:$0xff]  ;;  %v83_v7 = vld [vmem:[%s1670_s1 + $0x28] sm:$0xff] }
   0x3   :  { %v971_v5 = vpack.c.bf16 %v81_v4, %v80_v2  ;;  %v975_v8 = vpack.c.bf16 %v83_v7, %v82_v6  ;;  %v14_v9 = vld [vmem:[%s1671_s0] sm:$0xff]  ;;  %v84_v10 = vld [vmem:[%s1670_s1 + $0x30] sm:$0xff]  ;;  %v85_v11 = vld [vmem:[%s1670_s1 + $0x38] sm:$0xff] }
   0x4   :  { %968 = vmatprep.subr.bf16.mxu0 %v967_v3  ;;  %999 = vmatprep.subr.bf16.mxu1 %v967_v3  ;;  %v979_v12 = vpack.c.bf16 %v85_v11, %v84_v10  ;;  %v86_v13 = vld [vmem:[%s1670_s1 + $0x40] sm:$0xff]  ;;  %v87_v14 = vld [vmem:[%s1670_s1 + $0x48] sm:$0xff]  ;;  %v88_v16 = vld [vmem:[%s1670_s1 + $0x50] sm:$0xff] }
   0x5   :  { %970 = vmatpush3.bf16.msra.mxu0 %v967_v3  ;;  %1007 = vmatpush3.bf16.msra.mxu1 %v967_v3  ;;  %v983_v15 = vpack.c.bf16 %v87_v14, %v86_v13  ;;  %v89_v17 = vld [vmem:[%s1670_s1 + $0x58] sm:$0xff]  ;;  %v46_v18 = vld [vmem:[%s1671_s0 + $0x100] sm:$0xff]  ;;  %v91_v21 = vld [vmem:[%s1670_s1 + $0x68] sm:$0xff] }
   0x6   :  { %972 = vmatprep.subr.bf16.mxu0 %v971_v5  ;;  %1000 = vmatprep.subr.bf16.mxu1 %v971_v5  ;;  %v987_v19 = vpack.c.bf16 %v89_v17, %v88_v16  ;;  %v90_v20 = vld [vmem:[%s1670_s1 + $0x60] sm:$0xff]  ;;  %v92_v23 = vld [vmem:[%s1670_s1 + $0x70] sm:$0xff]  ;;  %v93_v24 = vld [vmem:[%s1670_s1 + $0x78] sm:$0xff] }
   0x7   :  { %871 = vmatprep.mubr.f32.mxu0 %v14_v9  ;;  %919 = vmatprep.mubr.f32.mxu1 %v46_v18  ;;  %v991_v22 = vpack.c.bf16 %v91_v21, %v90_v20  ;;  %v995_v25 = vpack.c.bf16 %v93_v24, %v92_v23  ;;  %v15_v26 = vld [vmem:[%s1671_s0 + $0x8] sm:$0xff]  ;;  %v16_v28 = vld [vmem:[%s1671_s0 + $0x10] sm:$0xff]  ;;  %v17_v30 = vld [vmem:[%s1671_s0 + $0x18] sm:$0xff] }
   0x8   :  { %v47_v27 = vld [vmem:[%s1671_s0 + $0x108] sm:$0xff]  ;;  %v48_v29 = vld [vmem:[%s1671_s0 + $0x110] sm:$0xff]  ;;  %v49_v31 = vld [vmem:[%s1671_s0 + $0x118] sm:$0xff] }
   0x9   :  { %974 = vmatpush3.bf16.msra.mxu0 %v971_v5  ;;  %1008 = vmatpush3.bf16.msra.mxu1 %v971_v5  ;;  %v18_v32 = vld [vmem:[%s1671_s0 + $0x20] sm:$0xff]  ;;  %v19_v34 = vld [vmem:[%s1671_s0 + $0x28] sm:$0xff]  ;;  %v20_v36 = vld [vmem:[%s1671_s0 + $0x30] sm:$0xff] }
   0xa   :  { %976 = vmatprep.subr.bf16.mxu0 %v975_v8  ;;  %1001 = vmatprep.subr.bf16.mxu1 %v975_v8  ;;  %v50_v33 = vld [vmem:[%s1671_s0 + $0x120] sm:$0xff]  ;;  %v51_v35 = vld [vmem:[%s1671_s0 + $0x128] sm:$0xff]  ;;  %v52_v37 = vld [vmem:[%s1671_s0 + $0x130] sm:$0xff] }
   0xb   :  { %v21_v38 = vld [vmem:[%s1671_s0 + $0x38] sm:$0xff]  ;;  %v22_v40 = vld [vmem:[%s1671_s0 + $0x40] sm:$0xff]  ;;  %v23_v42 = vld [vmem:[%s1671_s0 + $0x48] sm:$0xff] }
   0xc   :  { %v53_v39 = vld [vmem:[%s1671_s0 + $0x138] sm:$0xff]  ;;  %v54_v41 = vld [vmem:[%s1671_s0 + $0x140] sm:$0xff]  ;;  %v55_v43 = vld [vmem:[%s1671_s0 + $0x148] sm:$0xff] }
   0xd   :  { %978 = vmatpush3.bf16.msra.mxu0 %v975_v8  ;;  %1009 = vmatpush3.bf16.msra.mxu1 %v975_v8  ;;  %v24_v44 = vld [vmem:[%s1671_s0 + $0x50] sm:$0xff]  ;;  %v25_v46 = vld [vmem:[%s1671_s0 + $0x58] sm:$0xff]  ;;  %v26_v48 = vld [vmem:[%s1671_s0 + $0x60] sm:$0xff] }
   0xe   :  { %980 = vmatprep.subr.bf16.mxu0 %v979_v12  ;;  %1002 = vmatprep.subr.bf16.mxu1 %v979_v12  ;;  %v56_v45 = vld [vmem:[%s1671_s0 + $0x150] sm:$0xff]  ;;  %v57_v47 = vld [vmem:[%s1671_s0 + $0x158] sm:$0xff]  ;;  %v58_v49 = vld [vmem:[%s1671_s0 + $0x160] sm:$0xff] }
   0xf   :  { %v27_v50 = vld [vmem:[%s1671_s0 + $0x68] sm:$0xff]  ;;  %v28_v52 = vld [vmem:[%s1671_s0 + $0x70] sm:$0xff]  ;;  %v29_v54 = vld [vmem:[%s1671_s0 + $0x78] sm:$0xff] }
  0x10   :  { %v59_v51 = vld [vmem:[%s1671_s0 + $0x168] sm:$0xff]  ;;  %v60_v53 = vld [vmem:[%s1671_s0 + $0x170] sm:$0xff]  ;;  %v61_v55 = vld [vmem:[%s1671_s0 + $0x178] sm:$0xff] }
  0x11   :  { %982 = vmatpush3.bf16.msra.mxu0 %v979_v12  ;;  %1010 = vmatpush3.bf16.msra.mxu1 %v979_v12  ;;  %v30_v56 = vld [vmem:[%s1671_s0 + $0x80] sm:$0xff]  ;;  %v31_v58 = vld [vmem:[%s1671_s0 + $0x88] sm:$0xff]  ;;  %v32_v60 = vld [vmem:[%s1671_s0 + $0x90] sm:$0xff] }
  0x12   :  { %984 = vmatprep.subr.bf16.mxu0 %v983_v15  ;;  %1003 = vmatprep.subr.bf16.mxu1 %v983_v15  ;;  %v62_v57 = vld [vmem:[%s1671_s0 + $0x180] sm:$0xff]  ;;  %v63_v59 = vld [vmem:[%s1671_s0 + $0x188] sm:$0xff]  ;;  %v64_v61 = vld [vmem:[%s1671_s0 + $0x190] sm:$0xff] }
  0x13   :  { %v33_v62 = vld [vmem:[%s1671_s0 + $0x98] sm:$0xff]  ;;  %v34_v0 = vld [vmem:[%s1671_s0 + $0xa0] sm:$0xff]  ;;  %v35_v2 = vld [vmem:[%s1671_s0 + $0xa8] sm:$0xff] }
  0x14   :  { %v65_v63 = vld [vmem:[%s1671_s0 + $0x198] sm:$0xff]  ;;  %v66_v1 = vld [vmem:[%s1671_s0 + $0x1a0] sm:$0xff]  ;;  %v67_v3 = vld [vmem:[%s1671_s0 + $0x1a8] sm:$0xff] }
  0x15   :  { %986 = vmatpush3.bf16.msra.mxu0 %v983_v15  ;;  %1011 = vmatpush3.bf16.msra.mxu1 %v983_v15  ;;  %v36_v4 = vld [vmem:[%s1671_s0 + $0xb0] sm:$0xff]  ;;  %v37_v6 = vld [vmem:[%s1671_s0 + $0xb8] sm:$0xff]  ;;  %v38_v8 = vld [vmem:[%s1671_s0 + $0xc0] sm:$0xff] }
  0x16   :  { %988 = vmatprep.subr.bf16.mxu0 %v987_v19  ;;  %1004 = vmatprep.subr.bf16.mxu1 %v987_v19  ;;  %v68_v5 = vld [vmem:[%s1671_s0 + $0x1b0] sm:$0xff]  ;;  %v69_v7 = vld [vmem:[%s1671_s0 + $0x1b8] sm:$0xff]  ;;  %v70_v9 = vld [vmem:[%s1671_s0 + $0x1c0] sm:$0xff] }
  0x17   :  { %v39_v10 = vld [vmem:[%s1671_s0 + $0xc8] sm:$0xff]  ;;  %v40_v12 = vld [vmem:[%s1671_s0 + $0xd0] sm:$0xff]  ;;  %v41_v14 = vld [vmem:[%s1671_s0 + $0xd8] sm:$0xff] }
  0x18   :  { %v71_v11 = vld [vmem:[%s1671_s0 + $0x1c8] sm:$0xff]  ;;  %v72_v13 = vld [vmem:[%s1671_s0 + $0x1d0] sm:$0xff]  ;;  %v73_v15 = vld [vmem:[%s1671_s0 + $0x1d8] sm:$0xff] }
  0x19   :  { %990 = vmatpush3.bf16.msra.mxu0 %v987_v19  ;;  %1012 = vmatpush3.bf16.msra.mxu1 %v987_v19  ;;  %v42_v16 = vld [vmem:[%s1671_s0 + $0xe0] sm:$0xff]  ;;  %v43_v18 = vld [vmem:[%s1671_s0 + $0xe8] sm:$0xff]  ;;  %v44_v20 = vld [vmem:[%s1671_s0 + $0xf0] sm:$0xff] }
  0x1a   :  { %992 = vmatprep.subr.bf16.mxu0 %v991_v22  ;;  %1005 = vmatprep.subr.bf16.mxu1 %v991_v22  ;;  %v74_v17 = vld [vmem:[%s1671_s0 + $0x1e0] sm:$0xff]  ;;  %v75_v19 = vld [vmem:[%s1671_s0 + $0x1e8] sm:$0xff]  ;;  %v76_v21 = vld [vmem:[%s1671_s0 + $0x1f0] sm:$0xff] }
  0x1b   :  { %v77_v23 = vld [vmem:[%s1671_s0 + $0x1f8] sm:$0xff] }
  0x1d   :  { %994 = vmatpush3.bf16.msra.mxu0 %v991_v22  ;;  %1013 = vmatpush3.bf16.msra.mxu1 %v991_v22  ;;  %v45_v22 = vld [vmem:[%s1671_s0 + $0xf8] sm:$0xff] }
  0x1e   :  { %996 = vmatprep.subr.bf16.mxu0 %v995_v25  ;;  %1006 = vmatprep.subr.bf16.mxu1 %v995_v25 }
  0x21   :  { %998 = vmatpush3.bf16.msra.mxu0 %v995_v25  ;;  %1014 = vmatpush3.bf16.msra.mxu1 %v995_v25 }
  0x24   :  { %872 = vmatmul.mubr.f32.vlgmr.msra.gmra.mrb[0].mxu0 %v15_v26  ;;  %920 = vmatmul.mubr.f32.vlgmr.msra.gmra.mrb[0].mxu1 %v47_v27 }
  0x25   :  { %874 = vmatprep.mubr.f32.mxu0 %v16_v28  ;;  %922 = vmatprep.mubr.f32.mxu1 %v48_v29 }
  0x28   :  { %875 = vmatmul.mubr.f32.gmra.mrb[2].mxu0 %v17_v30  ;;  %923 = vmatmul.mubr.f32.gmra.mrb[2].mxu1 %v49_v31 }
  0x29   :  { %877 = vmatprep.mubr.f32.mxu0 %v18_v32  ;;  %925 = vmatprep.mubr.f32.mxu1 %v50_v33 }
  0x2c   :  { %878 = vmatmul.mubr.f32.gmra.mrb[4].mxu0 %v19_v34  ;;  %926 = vmatmul.mubr.f32.gmra.mrb[4].mxu1 %v51_v35 }
  0x2d   :  { %880 = vmatprep.mubr.f32.mxu0 %v20_v36  ;;  %928 = vmatprep.mubr.f32.mxu1 %v52_v37 }
  0x30   :  { %881 = vmatmul.mubr.f32.gmra.mrb[6].mxu0 %v21_v38  ;;  %929 = vmatmul.mubr.f32.gmra.mrb[6].mxu1 %v53_v39 }
  0x31   :  { %883 = vmatprep.mubr.f32.mxu0 %v22_v40  ;;  %931 = vmatprep.mubr.f32.mxu1 %v54_v41 }
  0x34   :  { %884 = vmatmul.mubr.f32.gmra.mrb[8].mxu0 %v23_v42  ;;  %932 = vmatmul.mubr.f32.gmra.mrb[8].mxu1 %v55_v43 }
  0x35   :  { %886 = vmatprep.mubr.f32.mxu0 %v24_v44  ;;  %934 = vmatprep.mubr.f32.mxu1 %v56_v45 }
  0x38   :  { %887 = vmatmul.mubr.f32.gmra.mrb[10].mxu0 %v25_v46  ;;  %935 = vmatmul.mubr.f32.gmra.mrb[10].mxu1 %v57_v47 }
  0x39   :  { %889 = vmatprep.mubr.f32.mxu0 %v26_v48  ;;  %937 = vmatprep.mubr.f32.mxu1 %v58_v49 }
  0x3c   :  { %890 = vmatmul.mubr.f32.gmra.mrb[12].mxu0 %v27_v50  ;;  %938 = vmatmul.mubr.f32.gmra.mrb[12].mxu1 %v59_v51 }
  0x3d   :  { %892 = vmatprep.mubr.f32.mxu0 %v28_v52  ;;  %940 = vmatprep.mubr.f32.mxu1 %v60_v53 }
  0x40   :  { %893 = vmatmul.mubr.f32.gmra.mrb[14].mxu0 %v29_v54  ;;  %941 = vmatmul.mubr.f32.gmra.mrb[14].mxu1 %v61_v55 }
  0x41   :  { %895 = vmatprep.mubr.f32.mxu0 %v30_v56  ;;  %943 = vmatprep.mubr.f32.mxu1 %v62_v57 }
  0x44   :  { %896 = vmatmul.mubr.f32.gmra.mrb[16].mxu0 %v31_v58  ;;  %944 = vmatmul.mubr.f32.gmra.mrb[16].mxu1 %v63_v59 }
  0x45   :  { %898 = vmatprep.mubr.f32.mxu0 %v32_v60  ;;  %946 = vmatprep.mubr.f32.mxu1 %v64_v61 }
  0x48   :  { %899 = vmatmul.mubr.f32.gmra.mrb[18].mxu0 %v33_v62  ;;  %947 = vmatmul.mubr.f32.gmra.mrb[18].mxu1 %v65_v63 }
  0x49   :  { %901 = vmatprep.mubr.f32.mxu0 %v34_v0  ;;  %949 = vmatprep.mubr.f32.mxu1 %v66_v1 }
  0x4c   :  { %902 = vmatmul.mubr.f32.gmra.mrb[20].mxu0 %v35_v2  ;;  %950 = vmatmul.mubr.f32.gmra.mrb[20].mxu1 %v67_v3 }
  0x4d   :  { %904 = vmatprep.mubr.f32.mxu0 %v36_v4  ;;  %952 = vmatprep.mubr.f32.mxu1 %v68_v5 }
  0x50   :  { %905 = vmatmul.mubr.f32.gmra.mrb[22].mxu0 %v37_v6  ;;  %953 = vmatmul.mubr.f32.gmra.mrb[22].mxu1 %v69_v7 }
  0x51   :  { %907 = vmatprep.mubr.f32.mxu0 %v38_v8  ;;  %955 = vmatprep.mubr.f32.mxu1 %v70_v9 }
  0x54   :  { %908 = vmatmul.mubr.f32.gmra.mrb[24].mxu0 %v39_v10  ;;  %956 = vmatmul.mubr.f32.gmra.mrb[24].mxu1 %v71_v11 }
  0x55   :  { %910 = vmatprep.mubr.f32.mxu0 %v40_v12  ;;  %958 = vmatprep.mubr.f32.mxu1 %v72_v13 }
  0x58   :  { %911 = vmatmul.mubr.f32.gmra.mrb[26].mxu0 %v41_v14  ;;  %959 = vmatmul.mubr.f32.gmra.mrb[26].mxu1 %v73_v15 }
  0x59   :  { %913 = vmatprep.mubr.f32.mxu0 %v42_v16  ;;  %961 = vmatprep.mubr.f32.mxu1 %v74_v17 }
  0x5c   :  { %914 = vmatmul.mubr.f32.gmra.mrb[28].mxu0 %v43_v18  ;;  %962 = vmatmul.mubr.f32.gmra.mrb[28].mxu1 %v75_v19 }
  0x5d   :  { %916 = vmatprep.mubr.f32.mxu0 %v44_v20  ;;  %964 = vmatprep.mubr.f32.mxu1 %v76_v21 }
  0x60   :  { %917 = vmatmul.mubr.f32.gmra.mrb[30].mxu0 %v45_v22  ;;  %965 = vmatmul.mubr.f32.gmra.mrb[30].mxu1 %v77_v23 }
  0xf7   :  { %v873_v24 = vpop.f32.mrb[0].mxu0  ;;  %v1280_v25 = vpop.f32.mrb[0].mxu1 }
  0xf8   :  { %480 = vst [vmem:[%s1672_s2 + $0x8] sm:$0xff] %v873_v24  ;;  %v613_v26 = vmul.f32 %v873_v24, %v873_v24  ;;  %v160_v27 = vpop.f32.mrb[1].mxu0  ;;  %512 = vst [vmem:[%s1672_s2 + $0x108] sm:$0xff] %v1280_v25  ;;  %v1289_v28 = vpop.f32.mrb[1].mxu1 }
  0xf9   :  { %479 = vst [vmem:[%s1672_s2] sm:$0xff] %v160_v27  ;;  %v543_v29 = vadd.f32 %v873_v24, %v160_v27  ;;  %v612_v30 = vmul.f32 %v160_v27, %v160_v27  ;;  %511 = vst [vmem:[%s1672_s2 + $0x100] sm:$0xff] %v1289_v28 }
  0xfb   :  { %v676_v31 = vadd.f32 %v613_v26, %v612_v30  ;;  %v876_v32 = vpop.f32.mrb[2].mxu0  ;;  %v1298_v33 = vpop.f32.mrb[2].mxu1 }
  0xfc   :  { %482 = vst [vmem:[%s1672_s2 + $0x18] sm:$0xff] %v876_v32  ;;  %v170_v34 = vpop.f32.mrb[3].mxu0  ;;  %514 = vst [vmem:[%s1672_s2 + $0x118] sm:$0xff] %v1298_v33  ;;  %v1307_v35 = vpop.f32.mrb[3].mxu1  ;;  %v615_v38 = vmul.f32 %v876_v32, %v876_v32 }
  0xfd   :  { %481 = vst [vmem:[%s1672_s2 + $0x10] sm:$0xff] %v170_v34  ;;  %v544_v36 = vadd.f32 %v543_v29, %v170_v34  ;;  %v614_v37 = vmul.f32 %v170_v34, %v170_v34  ;;  %513 = vst [vmem:[%s1672_s2 + $0x110] sm:$0xff] %v1307_v35 }
  0xff   :  { %v677_v39 = vadd.f32 %v676_v31, %v614_v37  ;;  %v879_v40 = vpop.f32.mrb[4].mxu0  ;;  %v545_v41 = vadd.f32 %v876_v32, %v544_v36  ;;  %v1316_v42 = vpop.f32.mrb[4].mxu1 }
 0x100   :  { %484 = vst [vmem:[%s1672_s2 + $0x28] sm:$0xff] %v879_v40  ;;  %v180_v43 = vpop.f32.mrb[5].mxu0  ;;  %516 = vst [vmem:[%s1672_s2 + $0x128] sm:$0xff] %v1316_v42  ;;  %v1325_v44 = vpop.f32.mrb[5].mxu1  ;;  %v617_v48 = vmul.f32 %v879_v40, %v879_v40 }
 0x101   :  { %483 = vst [vmem:[%s1672_s2 + $0x20] sm:$0xff] %v180_v43  ;;  %v546_v45 = vadd.f32 %v545_v41, %v180_v43  ;;  %v616_v46 = vmul.f32 %v180_v43, %v180_v43  ;;  %v678_v47 = vadd.f32 %v677_v39, %v615_v38  ;;  %515 = vst [vmem:[%s1672_s2 + $0x120] sm:$0xff] %v1325_v44 }
 0x103   :  { %v679_v49 = vadd.f32 %v678_v47, %v616_v46  ;;  %v882_v50 = vpop.f32.mrb[6].mxu0  ;;  %v547_v51 = vadd.f32 %v879_v40, %v546_v45  ;;  %v1334_v52 = vpop.f32.mrb[6].mxu1 }
 0x104   :  { %486 = vst [vmem:[%s1672_s2 + $0x38] sm:$0xff] %v882_v50  ;;  %v190_v53 = vpop.f32.mrb[7].mxu0  ;;  %518 = vst [vmem:[%s1672_s2 + $0x138] sm:$0xff] %v1334_v52  ;;  %v1343_v54 = vpop.f32.mrb[7].mxu1  ;;  %v619_v58 = vmul.f32 %v882_v50, %v882_v50 }
 0x105   :  { %485 = vst [vmem:[%s1672_s2 + $0x30] sm:$0xff] %v190_v53  ;;  %v548_v55 = vadd.f32 %v547_v51, %v190_v53  ;;  %v618_v56 = vmul.f32 %v190_v53, %v190_v53  ;;  %v680_v57 = vadd.f32 %v679_v49, %v617_v48  ;;  %517 = vst [vmem:[%s1672_s2 + $0x130] sm:$0xff] %v1343_v54 }
 0x107   :  { %v681_v59 = vadd.f32 %v680_v57, %v618_v56  ;;  %v885_v60 = vpop.f32.mrb[8].mxu0  ;;  %v549_v61 = vadd.f32 %v882_v50, %v548_v55  ;;  %v1352_v62 = vpop.f32.mrb[8].mxu1 }
 0x108   :  { %488 = vst [vmem:[%s1672_s2 + $0x48] sm:$0xff] %v885_v60  ;;  %v200_v63 = vpop.f32.mrb[9].mxu0  ;;  %520 = vst [vmem:[%s1672_s2 + $0x148] sm:$0xff] %v1352_v62  ;;  %v1361_v0 = vpop.f32.mrb[9].mxu1  ;;  %v621_v4 = vmul.f32 %v885_v60, %v885_v60 }
 0x109   :  { %487 = vst [vmem:[%s1672_s2 + $0x40] sm:$0xff] %v200_v63  ;;  %v550_v1 = vadd.f32 %v549_v61, %v200_v63  ;;  %v620_v2 = vmul.f32 %v200_v63, %v200_v63  ;;  %v682_v3 = vadd.f32 %v681_v59, %v619_v58  ;;  %519 = vst [vmem:[%s1672_s2 + $0x140] sm:$0xff] %v1361_v0 }
 0x10b   :  { %v683_v5 = vadd.f32 %v682_v3, %v620_v2  ;;  %v888_v6 = vpop.f32.mrb[10].mxu0  ;;  %v551_v7 = vadd.f32 %v885_v60, %v550_v1  ;;  %v1370_v8 = vpop.f32.mrb[10].mxu1 }
 0x10c   :  { %490 = vst [vmem:[%s1672_s2 + $0x58] sm:$0xff] %v888_v6  ;;  %v210_v9 = vpop.f32.mrb[11].mxu0  ;;  %522 = vst [vmem:[%s1672_s2 + $0x158] sm:$0xff] %v1370_v8  ;;  %v1379_v10 = vpop.f32.mrb[11].mxu1  ;;  %v623_v14 = vmul.f32 %v888_v6, %v888_v6 }
 0x10d   :  { %489 = vst [vmem:[%s1672_s2 + $0x50] sm:$0xff] %v210_v9  ;;  %v552_v11 = vadd.f32 %v551_v7, %v210_v9  ;;  %v622_v12 = vmul.f32 %v210_v9, %v210_v9  ;;  %v684_v13 = vadd.f32 %v683_v5, %v621_v4  ;;  %521 = vst [vmem:[%s1672_s2 + $0x150] sm:$0xff] %v1379_v10 }
 0x10f   :  { %v685_v15 = vadd.f32 %v684_v13, %v622_v12  ;;  %v891_v16 = vpop.f32.mrb[12].mxu0  ;;  %v553_v17 = vadd.f32 %v888_v6, %v552_v11  ;;  %v1388_v18 = vpop.f32.mrb[12].mxu1 }
 0x110   :  { %492 = vst [vmem:[%s1672_s2 + $0x68] sm:$0xff] %v891_v16  ;;  %v220_v19 = vpop.f32.mrb[13].mxu0  ;;  %524 = vst [vmem:[%s1672_s2 + $0x168] sm:$0xff] %v1388_v18  ;;  %v1397_v20 = vpop.f32.mrb[13].mxu1  ;;  %v625_v24 = vmul.f32 %v891_v16, %v891_v16 }
 0x111   :  { %491 = vst [vmem:[%s1672_s2 + $0x60] sm:$0xff] %v220_v19  ;;  %v554_v21 = vadd.f32 %v553_v17, %v220_v19  ;;  %v624_v22 = vmul.f32 %v220_v19, %v220_v19  ;;  %v686_v23 = vadd.f32 %v685_v15, %v623_v14  ;;  %523 = vst [vmem:[%s1672_s2 + $0x160] sm:$0xff] %v1397_v20 }
 0x113   :  { %v687_v26 = vadd.f32 %v686_v23, %v624_v22  ;;  %v894_v27 = vpop.f32.mrb[14].mxu0  ;;  %v555_v29 = vadd.f32 %v891_v16, %v554_v21  ;;  %v1406_v30 = vpop.f32.mrb[14].mxu1 }
 0x114   :  { %494 = vst [vmem:[%s1672_s2 + $0x78] sm:$0xff] %v894_v27  ;;  %v230_v31 = vpop.f32.mrb[15].mxu0  ;;  %526 = vst [vmem:[%s1672_s2 + $0x178] sm:$0xff] %v1406_v30  ;;  %v1415_v32 = vpop.f32.mrb[15].mxu1  ;;  %v627_v38 = vmul.f32 %v894_v27, %v894_v27 }
 0x115   :  { %493 = vst [vmem:[%s1672_s2 + $0x70] sm:$0xff] %v230_v31  ;;  %v556_v34 = vadd.f32 %v555_v29, %v230_v31  ;;  %v626_v36 = vmul.f32 %v230_v31, %v230_v31  ;;  %v688_v37 = vadd.f32 %v687_v26, %v625_v24  ;;  %525 = vst [vmem:[%s1672_s2 + $0x170] sm:$0xff] %v1415_v32 }
 0x117   :  { %v689_v39 = vadd.f32 %v688_v37, %v626_v36  ;;  %v897_v40 = vpop.f32.mrb[16].mxu0  ;;  %v557_v41 = vadd.f32 %v894_v27, %v556_v34  ;;  %v1424_v43 = vpop.f32.mrb[16].mxu1 }
 0x118   :  { %496 = vst [vmem:[%s1672_s2 + $0x88] sm:$0xff] %v897_v40  ;;  %v240_v45 = vpop.f32.mrb[17].mxu0  ;;  %528 = vst [vmem:[%s1672_s2 + $0x188] sm:$0xff] %v1424_v43  ;;  %v1433_v46 = vpop.f32.mrb[17].mxu1  ;;  %v629_v50 = vmul.f32 %v897_v40, %v897_v40 }
 0x119   :  { %495 = vst [vmem:[%s1672_s2 + $0x80] sm:$0xff] %v240_v45  ;;  %v558_v47 = vadd.f32 %v557_v41, %v240_v45  ;;  %v628_v48 = vmul.f32 %v240_v45, %v240_v45  ;;  %v690_v49 = vadd.f32 %v689_v39, %v627_v38  ;;  %527 = vst [vmem:[%s1672_s2 + $0x180] sm:$0xff] %v1433_v46 }
 0x11b   :  { %v691_v51 = vadd.f32 %v690_v49, %v628_v48  ;;  %v900_v53 = vpop.f32.mrb[18].mxu0  ;;  %v559_v55 = vadd.f32 %v897_v40, %v558_v47  ;;  %v1442_v56 = vpop.f32.mrb[18].mxu1 }
 0x11c   :  { %498 = vst [vmem:[%s1672_s2 + $0x98] sm:$0xff] %v900_v53  ;;  %v250_v57 = vpop.f32.mrb[19].mxu0  ;;  %530 = vst [vmem:[%s1672_s2 + $0x198] sm:$0xff] %v1442_v56  ;;  %v1451_v58 = vpop.f32.mrb[19].mxu1  ;;  %v631_v63 = vmul.f32 %v900_v53, %v900_v53 }
 0x11d   :  { %497 = vst [vmem:[%s1672_s2 + $0x90] sm:$0xff] %v250_v57  ;;  %v560_v59 = vadd.f32 %v559_v55, %v250_v57  ;;  %v630_v60 = vmul.f32 %v250_v57, %v250_v57  ;;  %v692_v61 = vadd.f32 %v691_v51, %v629_v50  ;;  %529 = vst [vmem:[%s1672_s2 + $0x190] sm:$0xff] %v1451_v58 }
 0x11f   :  { %v693_v1 = vadd.f32 %v692_v61, %v630_v60  ;;  %v903_v2 = vpop.f32.mrb[20].mxu0  ;;  %v561_v3 = vadd.f32 %v900_v53, %v560_v59  ;;  %v1460_v4 = vpop.f32.mrb[20].mxu1 }
 0x120   :  { %500 = vst [vmem:[%s1672_s2 + $0xa8] sm:$0xff] %v903_v2  ;;  %v260_v5 = vpop.f32.mrb[21].mxu0  ;;  %532 = vst [vmem:[%s1672_s2 + $0x1a8] sm:$0xff] %v1460_v4  ;;  %v1469_v6 = vpop.f32.mrb[21].mxu1  ;;  %v633_v12 = vmul.f32 %v903_v2, %v903_v2 }
 0x121   :  { %499 = vst [vmem:[%s1672_s2 + $0xa0] sm:$0xff] %v260_v5  ;;  %v562_v7 = vadd.f32 %v561_v3, %v260_v5  ;;  %v632_v9 = vmul.f32 %v260_v5, %v260_v5  ;;  %v694_v11 = vadd.f32 %v693_v1, %v631_v63  ;;  %531 = vst [vmem:[%s1672_s2 + $0x1a0] sm:$0xff] %v1469_v6 }
 0x123   :  { %v695_v13 = vadd.f32 %v694_v11, %v632_v9  ;;  %v906_v14 = vpop.f32.mrb[22].mxu0  ;;  %v563_v15 = vadd.f32 %v903_v2, %v562_v7  ;;  %v1478_v16 = vpop.f32.mrb[22].mxu1 }
 0x124   :  { %502 = vst [vmem:[%s1672_s2 + $0xb8] sm:$0xff] %v906_v14  ;;  %v270_v17 = vpop.f32.mrb[23].mxu0  ;;  %534 = vst [vmem:[%s1672_s2 + $0x1b8] sm:$0xff] %v1478_v16  ;;  %v1487_v19 = vpop.f32.mrb[23].mxu1  ;;  %v635_v24 = vmul.f32 %v906_v14, %v906_v14 }
 0x125   :  { %501 = vst [vmem:[%s1672_s2 + $0xb0] sm:$0xff] %v270_v17  ;;  %v564_v21 = vadd.f32 %v563_v15, %v270_v17  ;;  %v634_v22 = vmul.f32 %v270_v17, %v270_v17  ;;  %v696_v23 = vadd.f32 %v695_v13, %v633_v12  ;;  %533 = vst [vmem:[%s1672_s2 + $0x1b0] sm:$0xff] %v1487_v19 }
 0x127   :  { %v697_v26 = vadd.f32 %v696_v23, %v634_v22  ;;  %v909_v27 = vpop.f32.mrb[24].mxu0  ;;  %v565_v29 = vadd.f32 %v906_v14, %v564_v21  ;;  %v1496_v31 = vpop.f32.mrb[24].mxu1 }
 0x128   :  { %504 = vst [vmem:[%s1672_s2 + $0xc8] sm:$0xff] %v909_v27  ;;  %v280_v34 = vpop.f32.mrb[25].mxu0  ;;  %536 = vst [vmem:[%s1672_s2 + $0x1c8] sm:$0xff] %v1496_v31  ;;  %v1505_v36 = vpop.f32.mrb[25].mxu1  ;;  %v637_v40 = vmul.f32 %v909_v27, %v909_v27 }
 0x129   :  { %503 = vst [vmem:[%s1672_s2 + $0xc0] sm:$0xff] %v280_v34  ;;  %v566_v37 = vadd.f32 %v565_v29, %v280_v34  ;;  %v636_v38 = vmul.f32 %v280_v34, %v280_v34  ;;  %v698_v39 = vadd.f32 %v697_v26, %v635_v24  ;;  %535 = vst [vmem:[%s1672_s2 + $0x1c0] sm:$0xff] %v1505_v36 }
 0x12a   :  { %v644_v29 = vmul.f32 %v1289_v28, %v1289_v28 }
 0x12b   :  { %v699_v41 = vadd.f32 %v698_v39, %v636_v38  ;;  %v912_v45 = vpop.f32.mrb[26].mxu0  ;;  %v567_v47 = vadd.f32 %v909_v27, %v566_v37  ;;  %v1514_v48 = vpop.f32.mrb[26].mxu1  ;;  %v645_v38 = vmul.f32 %v1280_v25, %v1280_v25 }
 0x12c   :  { %506 = vst [vmem:[%s1672_s2 + $0xd8] sm:$0xff] %v912_v45  ;;  %v290_v49 = vpop.f32.mrb[27].mxu0  ;;  %538 = vst [vmem:[%s1672_s2 + $0x1d8] sm:$0xff] %v1514_v48  ;;  %v1523_v50 = vpop.f32.mrb[27].mxu1  ;;  %v639_v57 = vmul.f32 %v912_v45, %v912_v45 }
 0x12d   :  { %505 = vst [vmem:[%s1672_s2 + $0xd0] sm:$0xff] %v290_v49  ;;  %v568_v51 = vadd.f32 %v567_v47, %v290_v49  ;;  %v638_v53 = vmul.f32 %v290_v49, %v290_v49  ;;  %v700_v55 = vadd.f32 %v699_v41, %v637_v40  ;;  %537 = vst [vmem:[%s1672_s2 + $0x1d0] sm:$0xff] %v1523_v50 }
 0x12e   :  { %v646_v41 = vmul.f32 %v1307_v35, %v1307_v35  ;;  %v647_v49 = vmul.f32 %v1298_v33, %v1298_v33 }
 0x12f   :  { %v701_v59 = vadd.f32 %v700_v55, %v638_v53  ;;  %v915_v60 = vpop.f32.mrb[28].mxu0  ;;  %v569_v61 = vadd.f32 %v912_v45, %v568_v51  ;;  %v1532_v63 = vpop.f32.mrb[28].mxu1 }
 0x130   :  { %508 = vst [vmem:[%s1672_s2 + $0xe8] sm:$0xff] %v915_v60  ;;  %v300_v1 = vpop.f32.mrb[29].mxu0  ;;  %540 = vst [vmem:[%s1672_s2 + $0x1e8] sm:$0xff] %v1532_v63  ;;  %v1541_v2 = vpop.f32.mrb[29].mxu1  ;;  %v641_v9 = vmul.f32 %v915_v60, %v915_v60 }
 0x131   :  { %507 = vst [vmem:[%s1672_s2 + $0xe0] sm:$0xff] %v300_v1  ;;  %v570_v3 = vadd.f32 %v569_v61, %v300_v1  ;;  %v640_v5 = vmul.f32 %v300_v1, %v300_v1  ;;  %v702_v7 = vadd.f32 %v701_v59, %v639_v57  ;;  %539 = vst [vmem:[%s1672_s2 + $0x1e0] sm:$0xff] %v1541_v2 }
 0x133   :  { %v703_v11 = vadd.f32 %v702_v7, %v640_v5  ;;  %v918_v12 = vpop.f32.mrb[30].mxu0  ;;  %v571_v13 = vadd.f32 %v915_v60, %v570_v3  ;;  %v1550_v14 = vpop.f32.mrb[30].mxu1 }
 0x134   :  { %510 = vst [vmem:[%s1672_s2 + $0xf8] sm:$0xff] %v918_v12  ;;  %v310_v15 = vpop.f32.mrb[31].mxu0  ;;  %542 = vst [vmem:[%s1672_s2 + $0x1f8] sm:$0xff] %v1550_v14  ;;  %v1559_v17 = vpop.f32.mrb[31].mxu1  ;;  %v643_v24 = vmul.f32 %v918_v12, %v918_v12 }
 0x135   :  { %509 = vst [vmem:[%s1672_s2 + $0xf0] sm:$0xff] %v310_v15  ;;  %v572_v21 = vadd.f32 %v571_v13, %v310_v15  ;;  %v642_v22 = vmul.f32 %v310_v15, %v310_v15  ;;  %v704_v23 = vadd.f32 %v703_v11, %v641_v9  ;;  %541 = vst [vmem:[%s1672_s2 + $0x1f0] sm:$0xff] %v1559_v17 }
 0x137   :  { %v573_v26 = vadd.f32 %v918_v12, %v572_v21  ;;  %v705_v27 = vadd.f32 %v704_v23, %v642_v22 }
 0x139   :  { %v706_v34 = vadd.f32 %v705_v27, %v643_v24  ;;  %v574_v37 = vadd.f32 %v573_v26, %v1289_v28  ;;  %v648_v28 = vmul.f32 %v1325_v44, %v1325_v44 }
 0x13b   :  { %v707_v39 = vadd.f32 %v706_v34, %v644_v29  ;;  %v575_v40 = vadd.f32 %v1280_v25, %v574_v37  ;;  %v649_v25 = vmul.f32 %v1316_v42, %v1316_v42 }
 0x13d   :  { %v576_v45 = vadd.f32 %v575_v40, %v1307_v35  ;;  %v708_v47 = vadd.f32 %v707_v39, %v645_v38  ;;  %v650_v35 = vmul.f32 %v1343_v54, %v1343_v54 }
 0x13f   :  { %v709_v51 = vadd.f32 %v708_v47, %v646_v41  ;;  %v577_v53 = vadd.f32 %v1298_v33, %v576_v45  ;;  %v651_v33 = vmul.f32 %v1334_v52, %v1334_v52 }
 0x141   :  { %v578_v55 = vadd.f32 %v577_v53, %v1325_v44  ;;  %v710_v57 = vadd.f32 %v709_v51, %v647_v49  ;;  %v652_v44 = vmul.f32 %v1361_v0, %v1361_v0 }
 0x143   :  { %v711_v59 = vadd.f32 %v710_v57, %v648_v28  ;;  %v579_v60 = vadd.f32 %v1316_v42, %v578_v55  ;;  %v653_v42 = vmul.f32 %v1352_v62, %v1352_v62 }
 0x145   :  { %v580_v61 = vadd.f32 %v579_v60, %v1343_v54  ;;  %v712_v1 = vadd.f32 %v711_v59, %v649_v25  ;;  %v654_v54 = vmul.f32 %v1379_v10, %v1379_v10 }
 0x147   :  { %v713_v3 = vadd.f32 %v712_v1, %v650_v35  ;;  %v581_v5 = vadd.f32 %v1334_v52, %v580_v61  ;;  %v655_v52 = vmul.f32 %v1370_v8, %v1370_v8 }
 0x149   :  { %v582_v7 = vadd.f32 %v581_v5, %v1361_v0  ;;  %v714_v9 = vadd.f32 %v713_v3, %v651_v33  ;;  %v656_v0 = vmul.f32 %v1397_v20, %v1397_v20 }
 0x14b   :  { %v715_v11 = vadd.f32 %v714_v9, %v652_v44  ;;  %v583_v12 = vadd.f32 %v1352_v62, %v582_v7  ;;  %v657_v62 = vmul.f32 %v1388_v18, %v1388_v18 }
 0x14d   :  { %v584_v13 = vadd.f32 %v583_v12, %v1379_v10  ;;  %v716_v15 = vadd.f32 %v715_v11, %v653_v42  ;;  %v658_v10 = vmul.f32 %v1415_v32, %v1415_v32 }
 0x14f   :  { %v717_v21 = vadd.f32 %v716_v15, %v654_v54  ;;  %v585_v22 = vadd.f32 %v1370_v8, %v584_v13  ;;  %v659_v8 = vmul.f32 %v1406_v30, %v1406_v30 }
 0x151   :  { %v586_v23 = vadd.f32 %v585_v22, %v1397_v20  ;;  %v718_v24 = vadd.f32 %v717_v21, %v655_v52  ;;  %v660_v20 = vmul.f32 %v1433_v46, %v1433_v46 }
 0x153   :  { %v719_v26 = vadd.f32 %v718_v24, %v656_v0  ;;  %v587_v27 = vadd.f32 %v1388_v18, %v586_v23  ;;  %v661_v18 = vmul.f32 %v1424_v43, %v1424_v43 }
 0x155   :  { %v588_v29 = vadd.f32 %v587_v27, %v1415_v32  ;;  %v720_v34 = vadd.f32 %v719_v26, %v657_v62  ;;  %v662_v32 = vmul.f32 %v1451_v58, %v1451_v58 }
 0x157   :  { %v721_v37 = vadd.f32 %v720_v34, %v658_v10  ;;  %v589_v38 = vadd.f32 %v1406_v30, %v588_v29  ;;  %v663_v30 = vmul.f32 %v1442_v56, %v1442_v56 }
 0x159   :  { %v590_v39 = vadd.f32 %v589_v38, %v1433_v46  ;;  %v722_v40 = vadd.f32 %v721_v37, %v659_v8  ;;  %v664_v46 = vmul.f32 %v1469_v6, %v1469_v6 }
 0x15b   :  { %v723_v41 = vadd.f32 %v722_v40, %v660_v20  ;;  %v591_v45 = vadd.f32 %v1424_v43, %v590_v39  ;;  %v665_v43 = vmul.f32 %v1460_v4, %v1460_v4 }
 0x15d   :  { %v592_v47 = vadd.f32 %v591_v45, %v1451_v58  ;;  %v724_v49 = vadd.f32 %v723_v41, %v661_v18  ;;  %v666_v58 = vmul.f32 %v1487_v19, %v1487_v19 }
 0x15f   :  { %v725_v51 = vadd.f32 %v724_v49, %v662_v32  ;;  %v593_v53 = vadd.f32 %v1442_v56, %v592_v47  ;;  %v667_v56 = vmul.f32 %v1478_v16, %v1478_v16 }
 0x161   :  { %v594_v28 = vadd.f32 %v593_v53, %v1469_v6  ;;  %v726_v55 = vadd.f32 %v725_v51, %v663_v30  ;;  %v668_v6 = vmul.f32 %v1505_v36, %v1505_v36 }
 0x163   :  { %v727_v57 = vadd.f32 %v726_v55, %v664_v46  ;;  %v595_v25 = vadd.f32 %v1460_v4, %v594_v28  ;;  %v669_v4 = vmul.f32 %v1496_v31, %v1496_v31 }
 0x165   :  { %v596_v59 = vadd.f32 %v595_v25, %v1487_v19  ;;  %v728_v60 = vadd.f32 %v727_v57, %v665_v43  ;;  %v670_v19 = vmul.f32 %v1523_v50, %v1523_v50 }
 0x167   :  { %v729_v35 = vadd.f32 %v728_v60, %v666_v58  ;;  %v597_v61 = vadd.f32 %v1478_v16, %v596_v59  ;;  %v671_v16 = vmul.f32 %v1514_v48, %v1514_v48 }
 0x169   :  { %v598_v1 = vadd.f32 %v597_v61, %v1505_v36  ;;  %v730_v33 = vadd.f32 %v729_v35, %v667_v56  ;;  %v672_v36 = vmul.f32 %v1541_v2, %v1541_v2 }
 0x16b   :  { %v731_v3 = vadd.f32 %v730_v33, %v668_v6  ;;  %v599_v5 = vadd.f32 %v1496_v31, %v598_v1  ;;  %v673_v31 = vmul.f32 %v1532_v63, %v1532_v63 }
 0x16d   :  { %v600_v44 = vadd.f32 %v599_v5, %v1523_v50  ;;  %v732_v7 = vadd.f32 %v731_v3, %v669_v4  ;;  %v674_v50 = vmul.f32 %v1559_v17, %v1559_v17 }
 0x16f   :  { %v733_v9 = vadd.f32 %v732_v7, %v670_v19  ;;  %v601_v42 = vadd.f32 %v1514_v48, %v600_v44  ;;  %v675_v48 = vmul.f32 %v1550_v14, %v1550_v14 }
 0x171   :  { %v602_v11 = vadd.f32 %v601_v42, %v1541_v2  ;;  %v734_v12 = vadd.f32 %v733_v9, %v671_v16 }
 0x173   :  { %v735_v54 = vadd.f32 %v734_v12, %v672_v36  ;;  %v603_v13 = vadd.f32 %v1532_v63, %v602_v11 }
 0x175   :  { %v604_v15 = vadd.f32 %v603_v13, %v1559_v17  ;;  %v736_v52 = vadd.f32 %v735_v54, %v673_v31 }
 0x177   :  { %v605_v21 = vadd.f32 %v1550_v14, %v604_v15  ;;  %v737_v22 = vadd.f32 %v736_v52, %v674_v50 }
 0x179   :  { %v606_v2 = vrot.slane %v605_v21, 4  ;;  %v738_v0 = vadd.f32 %v737_v22, %v675_v48 }
 0x17b   :  { %v607_v23 = vadd.f32 %v606_v2, %v605_v21  ;;  %v739_v24 = vrot.slane %v738_v0, 4 }
 0x17d   :  { %v608_v62 = vrot.slane %v607_v23, 2  ;;  %v740_v26 = vadd.f32 %v739_v24, %v738_v0 }
 0x17f   :  { %v609_v27 = vadd.f32 %v608_v62, %v607_v23  ;;  %v741_v63 = vrot.slane %v740_v26, 2 }
 0x181   :  { %v610_v10 = vrot.slane %v609_v27, 1  ;;  %v742_v29 = vadd.f32 %v741_v63, %v740_v26 }
 0x183   :  { %v611_v34 = vadd.f32 %v610_v10, %v609_v27  ;;  %v743_v8 = vrot.slane %v742_v29, 1 }
 0x185   :  { %v744_v17 = vadd.f32 %v743_v8, %v742_v29  ;;  %745 = vst [vmem:[%s1673_s3] sm:$0xff] %v611_v34 }
 0x187   :  { %746 = vst [vmem:[%s1674_s4] sm:$0xff] %v744_v17 }

// kernel: residual_block_forward.7
= control target key start
LH: loop header
LB: loop body
LE: loop exit
PB: predicated region body
PF: predicated region fallthrough
CT: control target
= control target key end

     0   :  { %s1937_s4 = inlined_call_operand.vmem [shape: f32[128,128], index: 4, kind: input, shape index: {}]   ;;  %s1938_s3 = inlined_call_operand.vmem [shape: f32[512,128], index: 3, kind: input, shape index: {}]   ;;  %s1939_s0 = inlined_call_operand.vmem [shape: f32[512,128], index: 0, kind: input, shape index: {}]   ;;  %s1940_s1 = inlined_call_operand.vmem [shape: f32[1,128], index: 1, kind: input, shape index: {}]   ;;  %s1941_s2 = inlined_call_operand.vmem [shape: f32[1,128], index: 2, kind: input, shape index: {}]   ;;  %s1942_s5 = inlined_call_operand.vmem [shape: f32[512,128], index: 5, kind: output, shape index: {}]  }
   0x1   :  { %v84_v0 = vld [vmem:[%s1937_s4] sm:$0xff]  ;;  %v85_v1 = vld [vmem:[%s1937_s4 + $0x8] sm:$0xff]  ;;  %v86_v2 = vld [vmem:[%s1937_s4 + $0x10] sm:$0xff] }
   0x2   :  { %v1097_v3 = vpack.c.bf16 %v85_v1, %v84_v0  ;;  %v87_v4 = vld [vmem:[%s1937_s4 + $0x18] sm:$0xff]  ;;  %v88_v6 = vld [vmem:[%s1937_s4 + $0x20] sm:$0xff]  ;;  %v89_v7 = vld [vmem:[%s1937_s4 + $0x28] sm:$0xff] }
   0x3   :  { %v1101_v5 = vpack.c.bf16 %v87_v4, %v86_v2  ;;  %v1105_v8 = vpack.c.bf16 %v89_v7, %v88_v6  ;;  %v20_v9 = vld [vmem:[%s1938_s3] sm:$0xff]  ;;  %v90_v11 = vld [vmem:[%s1937_s4 + $0x30] sm:$0xff]  ;;  %v91_v12 = vld [vmem:[%s1937_s4 + $0x38] sm:$0xff] }
   0x4   :  { %1098 = vmatprep.subr.bf16.mxu0 %v1097_v3  ;;  %1129 = vmatprep.subr.bf16.mxu1 %v1097_v3  ;;  %v52_v10 = vld [vmem:[%s1938_s3 + $0x100] sm:$0xff]  ;;  %v1109_v13 = vpack.c.bf16 %v91_v12, %v90_v11  ;;  %v93_v15 = vld [vmem:[%s1937_s4 + $0x48] sm:$0xff]  ;;  %v94_v17 = vld [vmem:[%s1937_s4 + $0x50] sm:$0xff] }
   0x5   :  { %1100 = vmatpush3.bf16.msra.mxu0 %v1097_v3  ;;  %1137 = vmatpush3.bf16.msra.mxu1 %v1097_v3  ;;  %v92_v14 = vld [vmem:[%s1937_s4 + $0x40] sm:$0xff]  ;;  %v95_v18 = vld [vmem:[%s1937_s4 + $0x58] sm:$0xff]  ;;  %v97_v21 = vld [vmem:[%s1937_s4 + $0x68] sm:$0xff] }
   0x6   :  { %1102 = vmatprep.subr.bf16.mxu0 %v1101_v5  ;;  %1130 = vmatprep.subr.bf16.mxu1 %v1101_v5  ;;  %v1113_v16 = vpack.c.bf16 %v93_v15, %v92_v14  ;;  %v1117_v19 = vpack.c.bf16 %v95_v18, %v94_v17  ;;  %v96_v20 = vld [vmem:[%s1937_s4 + $0x60] sm:$0xff]  ;;  %v98_v23 = vld [vmem:[%s1937_s4 + $0x70] sm:$0xff]  ;;  %v99_v24 = vld [vmem:[%s1937_s4 + $0x78] sm:$0xff] }
   0x7   :  { %1001 = vmatprep.mubr.f32.mxu0 %v20_v9  ;;  %1049 = vmatprep.mubr.f32.mxu1 %v52_v10  ;;  %v1121_v22 = vpack.c.bf16 %v97_v21, %v96_v20  ;;  %v1125_v25 = vpack.c.bf16 %v99_v24, %v98_v23  ;;  %v21_v26 = vld [vmem:[%s1938_s3 + $0x8] sm:$0xff]  ;;  %v22_v28 = vld [vmem:[%s1938_s3 + $0x10] sm:$0xff]  ;;  %v23_v30 = vld [vmem:[%s1938_s3 + $0x18] sm:$0xff] }
   0x8   :  { %v53_v27 = vld [vmem:[%s1938_s3 + $0x108] sm:$0xff]  ;;  %v54_v29 = vld [vmem:[%s1938_s3 + $0x110] sm:$0xff]  ;;  %v55_v31 = vld [vmem:[%s1938_s3 + $0x118] sm:$0xff] }
   0x9   :  { %1104 = vmatpush3.bf16.msra.mxu0 %v1101_v5  ;;  %1138 = vmatpush3.bf16.msra.mxu1 %v1101_v5  ;;  %v24_v32 = vld [vmem:[%s1938_s3 + $0x20] sm:$0xff]  ;;  %v25_v34 = vld [vmem:[%s1938_s3 + $0x28] sm:$0xff]  ;;  %v26_v36 = vld [vmem:[%s1938_s3 + $0x30] sm:$0xff] }
   0xa   :  { %1106 = vmatprep.subr.bf16.mxu0 %v1105_v8  ;;  %1131 = vmatprep.subr.bf16.mxu1 %v1105_v8  ;;  %v56_v33 = vld [vmem:[%s1938_s3 + $0x120] sm:$0xff]  ;;  %v57_v35 = vld [vmem:[%s1938_s3 + $0x128] sm:$0xff]  ;;  %v58_v37 = vld [vmem:[%s1938_s3 + $0x130] sm:$0xff] }
   0xb   :  { %v27_v38 = vld [vmem:[%s1938_s3 + $0x38] sm:$0xff]  ;;  %v28_v40 = vld [vmem:[%s1938_s3 + $0x40] sm:$0xff]  ;;  %v29_v42 = vld [vmem:[%s1938_s3 + $0x48] sm:$0xff] }
   0xc   :  { %v59_v39 = vld [vmem:[%s1938_s3 + $0x138] sm:$0xff]  ;;  %v60_v41 = vld [vmem:[%s1938_s3 + $0x140] sm:$0xff]  ;;  %v61_v43 = vld [vmem:[%s1938_s3 + $0x148] sm:$0xff] }
   0xd   :  { %1108 = vmatpush3.bf16.msra.mxu0 %v1105_v8  ;;  %1139 = vmatpush3.bf16.msra.mxu1 %v1105_v8  ;;  %v30_v44 = vld [vmem:[%s1938_s3 + $0x50] sm:$0xff]  ;;  %v31_v46 = vld [vmem:[%s1938_s3 + $0x58] sm:$0xff]  ;;  %v32_v48 = vld [vmem:[%s1938_s3 + $0x60] sm:$0xff] }
   0xe   :  { %1110 = vmatprep.subr.bf16.mxu0 %v1109_v13  ;;  %1132 = vmatprep.subr.bf16.mxu1 %v1109_v13  ;;  %v62_v45 = vld [vmem:[%s1938_s3 + $0x150] sm:$0xff]  ;;  %v63_v47 = vld [vmem:[%s1938_s3 + $0x158] sm:$0xff]  ;;  %v64_v49 = vld [vmem:[%s1938_s3 + $0x160] sm:$0xff] }
   0xf   :  { %v33_v50 = vld [vmem:[%s1938_s3 + $0x68] sm:$0xff]  ;;  %v34_v52 = vld [vmem:[%s1938_s3 + $0x70] sm:$0xff]  ;;  %v35_v54 = vld [vmem:[%s1938_s3 + $0x78] sm:$0xff] }
  0x10   :  { %v65_v51 = vld [vmem:[%s1938_s3 + $0x168] sm:$0xff]  ;;  %v66_v53 = vld [vmem:[%s1938_s3 + $0x170] sm:$0xff]  ;;  %v67_v55 = vld [vmem:[%s1938_s3 + $0x178] sm:$0xff] }
  0x11   :  { %1112 = vmatpush3.bf16.msra.mxu0 %v1109_v13  ;;  %1140 = vmatpush3.bf16.msra.mxu1 %v1109_v13  ;;  %v36_v56 = vld [vmem:[%s1938_s3 + $0x80] sm:$0xff]  ;;  %v37_v58 = vld [vmem:[%s1938_s3 + $0x88] sm:$0xff]  ;;  %v38_v60 = vld [vmem:[%s1938_s3 + $0x90] sm:$0xff] }
  0x12   :  { %1114 = vmatprep.subr.bf16.mxu0 %v1113_v16  ;;  %1133 = vmatprep.subr.bf16.mxu1 %v1113_v16  ;;  %v68_v57 = vld [vmem:[%s1938_s3 + $0x180] sm:$0xff]  ;;  %v69_v59 = vld [vmem:[%s1938_s3 + $0x188] sm:$0xff]  ;;  %v70_v61 = vld [vmem:[%s1938_s3 + $0x190] sm:$0xff] }
  0x13   :  { %v39_v62 = vld [vmem:[%s1938_s3 + $0x98] sm:$0xff]  ;;  %v40_v0 = vld [vmem:[%s1938_s3 + $0xa0] sm:$0xff]  ;;  %v41_v2 = vld [vmem:[%s1938_s3 + $0xa8] sm:$0xff] }
  0x14   :  { %v71_v63 = vld [vmem:[%s1938_s3 + $0x198] sm:$0xff]  ;;  %v72_v1 = vld [vmem:[%s1938_s3 + $0x1a0] sm:$0xff]  ;;  %v73_v3 = vld [vmem:[%s1938_s3 + $0x1a8] sm:$0xff] }
  0x15   :  { %1116 = vmatpush3.bf16.msra.mxu0 %v1113_v16  ;;  %1141 = vmatpush3.bf16.msra.mxu1 %v1113_v16  ;;  %v42_v4 = vld [vmem:[%s1938_s3 + $0xb0] sm:$0xff]  ;;  %v43_v6 = vld [vmem:[%s1938_s3 + $0xb8] sm:$0xff]  ;;  %v44_v8 = vld [vmem:[%s1938_s3 + $0xc0] sm:$0xff] }
  0x16   :  { %1118 = vmatprep.subr.bf16.mxu0 %v1117_v19  ;;  %1134 = vmatprep.subr.bf16.mxu1 %v1117_v19  ;;  %v74_v5 = vld [vmem:[%s1938_s3 + $0x1b0] sm:$0xff]  ;;  %v75_v7 = vld [vmem:[%s1938_s3 + $0x1b8] sm:$0xff]  ;;  %v76_v9 = vld [vmem:[%s1938_s3 + $0x1c0] sm:$0xff] }
  0x17   :  { %v45_v10 = vld [vmem:[%s1938_s3 + $0xc8] sm:$0xff]  ;;  %v46_v12 = vld [vmem:[%s1938_s3 + $0xd0] sm:$0xff]  ;;  %v47_v14 = vld [vmem:[%s1938_s3 + $0xd8] sm:$0xff] }
  0x18   :  { %v77_v11 = vld [vmem:[%s1938_s3 + $0x1c8] sm:$0xff]  ;;  %v78_v13 = vld [vmem:[%s1938_s3 + $0x1d0] sm:$0xff]  ;;  %v79_v15 = vld [vmem:[%s1938_s3 + $0x1d8] sm:$0xff] }
  0x19   :  { %1120 = vmatpush3.bf16.msra.mxu0 %v1117_v19  ;;  %1142 = vmatpush3.bf16.msra.mxu1 %v1117_v19  ;;  %v48_v16 = vld [vmem:[%s1938_s3 + $0xe0] sm:$0xff]  ;;  %v49_v18 = vld [vmem:[%s1938_s3 + $0xe8] sm:$0xff]  ;;  %v50_v20 = vld [vmem:[%s1938_s3 + $0xf0] sm:$0xff] }
  0x1a   :  { %1122 = vmatprep.subr.bf16.mxu0 %v1121_v22  ;;  %1135 = vmatprep.subr.bf16.mxu1 %v1121_v22  ;;  %v80_v17 = vld [vmem:[%s1938_s3 + $0x1e0] sm:$0xff]  ;;  %v81_v19 = vld [vmem:[%s1938_s3 + $0x1e8] sm:$0xff]  ;;  %v82_v21 = vld [vmem:[%s1938_s3 + $0x1f0] sm:$0xff] }
  0x1b   :  { %v83_v23 = vld [vmem:[%s1938_s3 + $0x1f8] sm:$0xff]  ;;  %v486_v24 = vld [vmem:[%s1939_s0 + $0x8] sm:$0xff] }
  0x1d   :  { %1124 = vmatpush3.bf16.msra.mxu0 %v1121_v22  ;;  %1143 = vmatpush3.bf16.msra.mxu1 %v1121_v22  ;;  %v51_v22 = vld [vmem:[%s1938_s3 + $0xf8] sm:$0xff] }
  0x1e   :  { %1126 = vmatprep.subr.bf16.mxu0 %v1125_v25  ;;  %1136 = vmatprep.subr.bf16.mxu1 %v1125_v25 }
  0x21   :  { %1128 = vmatpush3.bf16.msra.mxu0 %v1125_v25  ;;  %1144 = vmatpush3.bf16.msra.mxu1 %v1125_v25  ;;  %v1421_v25 = vld [vmem:[%s1940_s1] ss:$0 sm:$0xff] }
  0x24   :  { %1002 = vmatmul.mubr.f32.vlgmr.msra.gmra.mrb[0].mxu0 %v21_v26  ;;  %1050 = vmatmul.mubr.f32.vlgmr.msra.gmra.mrb[0].mxu1 %v53_v27  ;;  %v518_v26 = vld [vmem:[%s1939_s0 + $0x108] sm:$0xff]  ;;  %v485_v27 = vld [vmem:[%s1939_s0] sm:$0xff] }
  0x25   :  { %1004 = vmatprep.mubr.f32.mxu0 %v22_v28  ;;  %1052 = vmatprep.mubr.f32.mxu1 %v54_v29  ;;  %v517_v28 = vld [vmem:[%s1939_s0 + $0x100] sm:$0xff]  ;;  %v557_v29 = vmul.f32 %v1421_v25, %v486_v24 }
  0x26   :  { %v493_v24 = vld [vmem:[%s1939_s0 + $0x40] sm:$0xff] }
  0x28   :  { %1005 = vmatmul.mubr.f32.gmra.mrb[2].mxu0 %v23_v30  ;;  %1053 = vmatmul.mubr.f32.gmra.mrb[2].mxu1 %v55_v31  ;;  %v589_v30 = vmul.f32 %v1421_v25, %v518_v26  ;;  %v1437_v31 = vld [vmem:[%s1941_s2] ss:$0 sm:$0xff] }
  0x29   :  { %1007 = vmatprep.mubr.f32.mxu0 %v24_v32  ;;  %1055 = vmatprep.mubr.f32.mxu1 %v56_v33  ;;  %v556_v32 = vmul.f32 %v1421_v25, %v485_v27  ;;  %v588_v33 = vmul.f32 %v1421_v25, %v517_v28  ;;  %v525_v26 = vld [vmem:[%s1939_s0 + $0x140] sm:$0xff] }
  0x2c   :  { %1008 = vmatmul.mubr.f32.gmra.mrb[4].mxu0 %v25_v34  ;;  %1056 = vmatmul.mubr.f32.gmra.mrb[4].mxu1 %v57_v35  ;;  %v488_v34 = vld [vmem:[%s1939_s0 + $0x18] sm:$0xff] }
  0x2d   :  { %1010 = vmatprep.mubr.f32.mxu0 %v26_v36  ;;  %1058 = vmatprep.mubr.f32.mxu1 %v58_v37  ;;  %v520_v35 = vld [vmem:[%s1939_s0 + $0x118] sm:$0xff]  ;;  %v487_v36 = vld [vmem:[%s1939_s0 + $0x10] sm:$0xff] }
  0x2e   :  { %v519_v37 = vld [vmem:[%s1939_s0 + $0x110] sm:$0xff] }
  0x30   :  { %1011 = vmatmul.mubr.f32.gmra.mrb[6].mxu0 %v27_v38  ;;  %1059 = vmatmul.mubr.f32.gmra.mrb[6].mxu1 %v59_v39  ;;  %v490_v38 = vld [vmem:[%s1939_s0 + $0x28] sm:$0xff] }
  0x31   :  { %1013 = vmatprep.mubr.f32.mxu0 %v28_v40  ;;  %1061 = vmatprep.mubr.f32.mxu1 %v60_v41  ;;  %v522_v39 = vld [vmem:[%s1939_s0 + $0x128] sm:$0xff]  ;;  %v628_v40 = vadd.f32 %v1437_v31, %v557_v29  ;;  %v660_v41 = vadd.f32 %v1437_v31, %v589_v30 }
  0x34   :  { %1014 = vmatmul.mubr.f32.gmra.mrb[8].mxu0 %v29_v42  ;;  %1062 = vmatmul.mubr.f32.gmra.mrb[8].mxu1 %v61_v43  ;;  %v559_v42 = vmul.f32 %v1421_v25, %v488_v34  ;;  %v591_v43 = vmul.f32 %v1421_v25, %v520_v35 }
  0x35   :  { %1016 = vmatprep.mubr.f32.mxu0 %v30_v44  ;;  %1064 = vmatprep.mubr.f32.mxu1 %v62_v45  ;;  %v489_v44 = vld [vmem:[%s1939_s0 + $0x20] sm:$0xff] }
  0x36   :  { %v521_v45 = vld [vmem:[%s1939_s0 + $0x120] sm:$0xff] }
  0x38   :  { %1017 = vmatmul.mubr.f32.gmra.mrb[10].mxu0 %v31_v46  ;;  %1065 = vmatmul.mubr.f32.gmra.mrb[10].mxu1 %v63_v47  ;;  %v627_v46 = vadd.f32 %v1437_v31, %v556_v32  ;;  %v659_v47 = vadd.f32 %v1437_v31, %v588_v33 }
  0x39   :  { %1019 = vmatprep.mubr.f32.mxu0 %v32_v48  ;;  %1067 = vmatprep.mubr.f32.mxu1 %v64_v49  ;;  %v558_v48 = vmul.f32 %v1421_v25, %v487_v36  ;;  %v590_v49 = vmul.f32 %v1421_v25, %v519_v37 }
  0x3c   :  { %1020 = vmatmul.mubr.f32.gmra.mrb[12].mxu0 %v33_v50  ;;  %1068 = vmatmul.mubr.f32.gmra.mrb[12].mxu1 %v65_v51  ;;  %v561_v50 = vmul.f32 %v1421_v25, %v490_v38  ;;  %v593_v51 = vmul.f32 %v1421_v25, %v522_v39 }
  0x3d   :  { %1022 = vmatprep.mubr.f32.mxu0 %v34_v52  ;;  %1070 = vmatprep.mubr.f32.mxu1 %v66_v53 }
  0x40   :  { %1023 = vmatmul.mubr.f32.gmra.mrb[14].mxu0 %v35_v54  ;;  %1071 = vmatmul.mubr.f32.gmra.mrb[14].mxu1 %v67_v55  ;;  %v560_v54 = vmul.f32 %v1421_v25, %v489_v44  ;;  %v592_v55 = vmul.f32 %v1421_v25, %v521_v45 }
  0x41   :  { %1025 = vmatprep.mubr.f32.mxu0 %v36_v56  ;;  %1073 = vmatprep.mubr.f32.mxu1 %v68_v57 }
  0x44   :  { %1026 = vmatmul.mubr.f32.gmra.mrb[16].mxu0 %v37_v58  ;;  %1074 = vmatmul.mubr.f32.gmra.mrb[16].mxu1 %v69_v59 }
  0x45   :  { %1028 = vmatprep.mubr.f32.mxu0 %v38_v60  ;;  %1076 = vmatprep.mubr.f32.mxu1 %v70_v61  ;;  %v630_v60 = vadd.f32 %v1437_v31, %v559_v42  ;;  %v662_v61 = vadd.f32 %v1437_v31, %v591_v43 }
  0x48   :  { %1029 = vmatmul.mubr.f32.gmra.mrb[18].mxu0 %v39_v62  ;;  %1077 = vmatmul.mubr.f32.gmra.mrb[18].mxu1 %v71_v63 }
  0x49   :  { %1031 = vmatprep.mubr.f32.mxu0 %v40_v0  ;;  %1079 = vmatprep.mubr.f32.mxu1 %v72_v1  ;;  %v629_v0 = vadd.f32 %v1437_v31, %v558_v48  ;;  %v661_v1 = vadd.f32 %v1437_v31, %v590_v49 }
  0x4c   :  { %1032 = vmatmul.mubr.f32.gmra.mrb[20].mxu0 %v41_v2  ;;  %1080 = vmatmul.mubr.f32.gmra.mrb[20].mxu1 %v73_v3  ;;  %v492_v2 = vld [vmem:[%s1939_s0 + $0x38] sm:$0xff] }
  0x4d   :  { %1034 = vmatprep.mubr.f32.mxu0 %v42_v4  ;;  %1082 = vmatprep.mubr.f32.mxu1 %v74_v5  ;;  %v524_v3 = vld [vmem:[%s1939_s0 + $0x138] sm:$0xff] }
  0x50   :  { %1035 = vmatmul.mubr.f32.gmra.mrb[22].mxu0 %v43_v6  ;;  %1083 = vmatmul.mubr.f32.gmra.mrb[22].mxu1 %v75_v7  ;;  %v632_v6 = vadd.f32 %v1437_v31, %v561_v50  ;;  %v664_v7 = vadd.f32 %v1437_v31, %v593_v51 }
  0x51   :  { %1037 = vmatprep.mubr.f32.mxu0 %v44_v8  ;;  %1085 = vmatprep.mubr.f32.mxu1 %v76_v9  ;;  %v491_v8 = vld [vmem:[%s1939_s0 + $0x30] sm:$0xff] }
  0x52   :  { %v523_v9 = vld [vmem:[%s1939_s0 + $0x130] sm:$0xff]  ;;  %v562_v29 = vmul.f32 %v1421_v25, %v491_v8 }
  0x53   :  { %v594_v30 = vmul.f32 %v1421_v25, %v523_v9 }
  0x54   :  { %1038 = vmatmul.mubr.f32.gmra.mrb[24].mxu0 %v45_v10  ;;  %1086 = vmatmul.mubr.f32.gmra.mrb[24].mxu1 %v77_v11  ;;  %v633_v50 = vadd.f32 %v1437_v31, %v562_v29 }
  0x55   :  { %1040 = vmatprep.mubr.f32.mxu0 %v46_v12  ;;  %1088 = vmatprep.mubr.f32.mxu1 %v78_v13  ;;  %v665_v51 = vadd.f32 %v1437_v31, %v594_v30 }
  0x58   :  { %1041 = vmatmul.mubr.f32.gmra.mrb[26].mxu0 %v47_v14  ;;  %1089 = vmatmul.mubr.f32.gmra.mrb[26].mxu1 %v79_v15  ;;  %v631_v14 = vadd.f32 %v1437_v31, %v560_v54  ;;  %v663_v15 = vadd.f32 %v1437_v31, %v592_v55 }
  0x59   :  { %1043 = vmatprep.mubr.f32.mxu0 %v48_v16  ;;  %1091 = vmatprep.mubr.f32.mxu1 %v80_v17  ;;  %v494_v16 = vld [vmem:[%s1939_s0 + $0x48] sm:$0xff] }
  0x5a   :  { %v526_v17 = vld [vmem:[%s1939_s0 + $0x148] sm:$0xff]  ;;  %v565_v34 = vmul.f32 %v1421_v25, %v494_v16 }
  0x5b   :  { %v597_v35 = vmul.f32 %v1421_v25, %v526_v17 }
  0x5c   :  { %1044 = vmatmul.mubr.f32.gmra.mrb[28].mxu0 %v49_v18  ;;  %1092 = vmatmul.mubr.f32.gmra.mrb[28].mxu1 %v81_v19 }
  0x5d   :  { %1046 = vmatprep.mubr.f32.mxu0 %v50_v20  ;;  %1094 = vmatprep.mubr.f32.mxu1 %v82_v21 }
  0x60   :  { %1047 = vmatmul.mubr.f32.gmra.mrb[30].mxu0 %v51_v22  ;;  %1095 = vmatmul.mubr.f32.gmra.mrb[30].mxu1 %v83_v23  ;;  %v563_v22 = vmul.f32 %v1421_v25, %v492_v2  ;;  %v595_v23 = vmul.f32 %v1421_v25, %v524_v3  ;;  %v498_v2 = vld [vmem:[%s1939_s0 + $0x68] sm:$0xff] }
  0x61   :  { %v530_v3 = vld [vmem:[%s1939_s0 + $0x168] sm:$0xff] }
  0xf7   :  { %v1003_v52 = vpop.f32.mrb[0].mxu0  ;;  %v1051_v53 = vpop.f32.mrb[0].mxu1 }
  0xf8   :  { %v692_v56 = vadd.f32 %v1003_v52, %v628_v40  ;;  %v724_v57 = vadd.f32 %v1051_v53, %v660_v41  ;;  %v166_v58 = vpop.f32.mrb[1].mxu0  ;;  %v326_v59 = vpop.f32.mrb[1].mxu1  ;;  %v564_v40 = vmul.f32 %v1421_v25, %v493_v24  ;;  %v596_v41 = vmul.f32 %v1421_v25, %v525_v26  ;;  %v496_v52 = vld [vmem:[%s1939_s0 + $0x58] sm:$0xff] }
  0xf9   :  { %v691_v62 = vadd.f32 %v627_v46, %v166_v58  ;;  %v723_v63 = vadd.f32 %v659_v47, %v326_v59  ;;  %v634_v46 = vadd.f32 %v1437_v31, %v563_v22  ;;  %v666_v47 = vadd.f32 %v1437_v31, %v595_v23  ;;  %v528_v53 = vld [vmem:[%s1939_s0 + $0x158] sm:$0xff]  ;;  %v495_v58 = vld [vmem:[%s1939_s0 + $0x50] sm:$0xff] }
  0xfa   :  { %v756_v4 = vmax.f32 %v692_v56, 0.0  ;;  %v788_v5 = vmax.f32 %v724_v57, 0.0  ;;  %v636_v56 = vadd.f32 %v1437_v31, %v565_v34  ;;  %v668_v57 = vadd.f32 %v1437_v31, %v597_v35  ;;  %v527_v59 = vld [vmem:[%s1939_s0 + $0x150] sm:$0xff] }
  0xfb   :  { %v755_v10 = vmax.f32 %v691_v62, 0.0  ;;  %v787_v11 = vmax.f32 %v723_v63, 0.0  ;;  %v1006_v12 = vpop.f32.mrb[2].mxu0  ;;  %v1054_v13 = vpop.f32.mrb[2].mxu1  ;;  %v567_v8 = vmul.f32 %v1421_v25, %v496_v52  ;;  %v599_v9 = vmul.f32 %v1421_v25, %v528_v53  ;;  %v502_v52 = vld [vmem:[%s1939_s0 + $0x88] sm:$0xff] }
  0xfc   :  { %820 = vst [vmem:[%s1942_s5 + $0x8] sm:$0xff] %v756_v4  ;;  %852 = vst [vmem:[%s1942_s5 + $0x108] sm:$0xff] %v788_v5  ;;  %v694_v18 = vadd.f32 %v1006_v12, %v630_v60  ;;  %v726_v19 = vadd.f32 %v1054_v13, %v662_v61  ;;  %v176_v20 = vpop.f32.mrb[3].mxu0  ;;  %v336_v21 = vpop.f32.mrb[3].mxu1  ;;  %v534_v53 = vld [vmem:[%s1939_s0 + $0x188] sm:$0xff] }
  0xfd   :  { %819 = vst [vmem:[%s1942_s5] sm:$0xff] %v755_v10  ;;  %851 = vst [vmem:[%s1942_s5 + $0x100] sm:$0xff] %v787_v11  ;;  %v693_v27 = vadd.f32 %v629_v0, %v176_v20  ;;  %v725_v28 = vadd.f32 %v661_v1, %v336_v21  ;;  %v635_v0 = vadd.f32 %v1437_v31, %v564_v40  ;;  %v497_v10 = vld [vmem:[%s1939_s0 + $0x60] sm:$0xff] }
  0xfe   :  { %v758_v32 = vmax.f32 %v694_v18, 0.0  ;;  %v790_v33 = vmax.f32 %v726_v19, 0.0  ;;  %v667_v1 = vadd.f32 %v1437_v31, %v596_v41  ;;  %v529_v11 = vld [vmem:[%s1939_s0 + $0x160] sm:$0xff]  ;;  %v569_v18 = vmul.f32 %v1421_v25, %v498_v2 }
  0xff   :  { %v757_v36 = vmax.f32 %v693_v27, 0.0  ;;  %v789_v37 = vmax.f32 %v725_v28, 0.0  ;;  %v1009_v38 = vpop.f32.mrb[4].mxu0  ;;  %v1057_v39 = vpop.f32.mrb[4].mxu1  ;;  %v601_v19 = vmul.f32 %v1421_v25, %v530_v3  ;;  %v568_v24 = vmul.f32 %v1421_v25, %v497_v10 }
 0x100   :  { %822 = vst [vmem:[%s1942_s5 + $0x18] sm:$0xff] %v758_v32  ;;  %854 = vst [vmem:[%s1942_s5 + $0x118] sm:$0xff] %v790_v33  ;;  %v696_v42 = vadd.f32 %v1009_v38, %v632_v6  ;;  %v728_v43 = vadd.f32 %v1057_v39, %v664_v7  ;;  %v186_v44 = vpop.f32.mrb[5].mxu0  ;;  %v346_v45 = vpop.f32.mrb[5].mxu1  ;;  %v600_v26 = vmul.f32 %v1421_v25, %v529_v11  ;;  %v500_v38 = vld [vmem:[%s1939_s0 + $0x78] sm:$0xff] }
 0x101   :  { %821 = vst [vmem:[%s1942_s5 + $0x10] sm:$0xff] %v757_v36  ;;  %853 = vst [vmem:[%s1942_s5 + $0x110] sm:$0xff] %v789_v37  ;;  %v695_v48 = vadd.f32 %v631_v14, %v186_v44  ;;  %v727_v49 = vadd.f32 %v663_v15, %v346_v45  ;;  %v566_v14 = vmul.f32 %v1421_v25, %v495_v58  ;;  %v532_v39 = vld [vmem:[%s1939_s0 + $0x178] sm:$0xff]  ;;  %v499_v44 = vld [vmem:[%s1939_s0 + $0x70] sm:$0xff] }
 0x102   :  { %v760_v54 = vmax.f32 %v696_v42, 0.0  ;;  %v792_v55 = vmax.f32 %v728_v43, 0.0  ;;  %v598_v15 = vmul.f32 %v1421_v25, %v527_v59  ;;  %v638_v32 = vadd.f32 %v1437_v31, %v567_v8  ;;  %v531_v45 = vld [vmem:[%s1939_s0 + $0x170] sm:$0xff] }
 0x103   :  { %v759_v60 = vmax.f32 %v695_v48, 0.0  ;;  %v791_v61 = vmax.f32 %v727_v49, 0.0  ;;  %v1012_v62 = vpop.f32.mrb[6].mxu0  ;;  %v1060_v63 = vpop.f32.mrb[6].mxu1  ;;  %v670_v33 = vadd.f32 %v1437_v31, %v599_v9  ;;  %v637_v36 = vadd.f32 %v1437_v31, %v566_v14 }
 0x104   :  { %824 = vst [vmem:[%s1942_s5 + $0x28] sm:$0xff] %v760_v54  ;;  %856 = vst [vmem:[%s1942_s5 + $0x128] sm:$0xff] %v792_v55  ;;  %v698_v4 = vadd.f32 %v1012_v62, %v634_v46  ;;  %v730_v5 = vadd.f32 %v1060_v63, %v666_v47  ;;  %v196_v6 = vpop.f32.mrb[7].mxu0  ;;  %v356_v7 = vpop.f32.mrb[7].mxu1  ;;  %v669_v37 = vadd.f32 %v1437_v31, %v598_v15 }
 0x105   :  { %823 = vst [vmem:[%s1942_s5 + $0x20] sm:$0xff] %v759_v60  ;;  %855 = vst [vmem:[%s1942_s5 + $0x120] sm:$0xff] %v791_v61  ;;  %v697_v12 = vadd.f32 %v633_v50, %v196_v6  ;;  %v729_v13 = vadd.f32 %v665_v51, %v356_v7  ;;  %v640_v42 = vadd.f32 %v1437_v31, %v569_v18  ;;  %v501_v60 = vld [vmem:[%s1939_s0 + $0x80] sm:$0xff] }
 0x106   :  { %v762_v16 = vmax.f32 %v698_v4, 0.0  ;;  %v794_v17 = vmax.f32 %v730_v5, 0.0  ;;  %v672_v43 = vadd.f32 %v1437_v31, %v601_v19  ;;  %v639_v50 = vadd.f32 %v1437_v31, %v568_v24  ;;  %v533_v61 = vld [vmem:[%s1939_s0 + $0x180] sm:$0xff] }
 0x107   :  { %v761_v20 = vmax.f32 %v697_v12, 0.0  ;;  %v793_v21 = vmax.f32 %v729_v13, 0.0  ;;  %v1015_v22 = vpop.f32.mrb[8].mxu0  ;;  %v1063_v23 = vpop.f32.mrb[8].mxu1  ;;  %v671_v51 = vadd.f32 %v1437_v31, %v600_v26  ;;  %v571_v58 = vmul.f32 %v1421_v25, %v500_v38  ;;  %v506_v38 = vld [vmem:[%s1939_s0 + $0xa8] sm:$0xff] }
 0x108   :  { %826 = vst [vmem:[%s1942_s5 + $0x38] sm:$0xff] %v762_v16  ;;  %858 = vst [vmem:[%s1942_s5 + $0x138] sm:$0xff] %v794_v17  ;;  %v700_v27 = vadd.f32 %v1015_v22, %v636_v56  ;;  %v732_v28 = vadd.f32 %v1063_v23, %v668_v57  ;;  %v206_v29 = vpop.f32.mrb[9].mxu0  ;;  %v366_v30 = vpop.f32.mrb[9].mxu1  ;;  %v603_v59 = vmul.f32 %v1421_v25, %v532_v39  ;;  %v504_v22 = vld [vmem:[%s1939_s0 + $0x98] sm:$0xff]  ;;  %v538_v39 = vld [vmem:[%s1939_s0 + $0x1a8] sm:$0xff] }
 0x109   :  { %825 = vst [vmem:[%s1942_s5 + $0x30] sm:$0xff] %v761_v20  ;;  %857 = vst [vmem:[%s1942_s5 + $0x130] sm:$0xff] %v793_v21  ;;  %v699_v34 = vadd.f32 %v635_v0, %v206_v29  ;;  %v731_v35 = vadd.f32 %v667_v1, %v366_v30  ;;  %v570_v0 = vmul.f32 %v1421_v25, %v499_v44  ;;  %v536_v23 = vld [vmem:[%s1939_s0 + $0x198] sm:$0xff]  ;;  %v503_v29 = vld [vmem:[%s1939_s0 + $0x90] sm:$0xff] }
 0x10a   :  { %v764_v40 = vmax.f32 %v700_v27, 0.0  ;;  %v796_v41 = vmax.f32 %v732_v28, 0.0  ;;  %v602_v1 = vmul.f32 %v1421_v25, %v531_v45  ;;  %v573_v4 = vmul.f32 %v1421_v25, %v502_v52  ;;  %v535_v30 = vld [vmem:[%s1939_s0 + $0x190] sm:$0xff] }
 0x10b   :  { %v763_v46 = vmax.f32 %v699_v34, 0.0  ;;  %v795_v47 = vmax.f32 %v731_v35, 0.0  ;;  %v1018_v48 = vpop.f32.mrb[10].mxu0  ;;  %v1066_v49 = vpop.f32.mrb[10].mxu1  ;;  %v605_v5 = vmul.f32 %v1421_v25, %v534_v53  ;;  %v572_v10 = vmul.f32 %v1421_v25, %v501_v60 }
 0x10c   :  { %828 = vst [vmem:[%s1942_s5 + $0x48] sm:$0xff] %v764_v40  ;;  %860 = vst [vmem:[%s1942_s5 + $0x148] sm:$0xff] %v796_v41  ;;  %v702_v54 = vadd.f32 %v1018_v48, %v638_v32  ;;  %v734_v55 = vadd.f32 %v1066_v49, %v670_v33  ;;  %v216_v56 = vpop.f32.mrb[11].mxu0  ;;  %v376_v57 = vpop.f32.mrb[11].mxu1  ;;  %v604_v11 = vmul.f32 %v1421_v25, %v533_v61 }
 0x10d   :  { %827 = vst [vmem:[%s1942_s5 + $0x40] sm:$0xff] %v763_v46  ;;  %859 = vst [vmem:[%s1942_s5 + $0x140] sm:$0xff] %v795_v47  ;;  %v701_v62 = vadd.f32 %v637_v36, %v216_v56  ;;  %v733_v63 = vadd.f32 %v669_v37, %v376_v57  ;;  %v642_v16 = vadd.f32 %v1437_v31, %v571_v58  ;;  %v505_v46 = vld [vmem:[%s1939_s0 + $0xa0] sm:$0xff] }
 0x10e   :  { %v766_v2 = vmax.f32 %v702_v54, 0.0  ;;  %v798_v3 = vmax.f32 %v734_v55, 0.0  ;;  %v674_v17 = vadd.f32 %v1437_v31, %v603_v59  ;;  %v641_v20 = vadd.f32 %v1437_v31, %v570_v0  ;;  %v537_v47 = vld [vmem:[%s1939_s0 + $0x1a0] sm:$0xff] }
 0x10f   :  { %v765_v6 = vmax.f32 %v701_v62, 0.0  ;;  %v797_v7 = vmax.f32 %v733_v63, 0.0  ;;  %v1021_v8 = vpop.f32.mrb[12].mxu0  ;;  %v1069_v9 = vpop.f32.mrb[12].mxu1  ;;  %v673_v21 = vadd.f32 %v1437_v31, %v602_v1  ;;  %v644_v27 = vadd.f32 %v1437_v31, %v573_v4 }
 0x110   :  { %830 = vst [vmem:[%s1942_s5 + $0x58] sm:$0xff] %v766_v2  ;;  %862 = vst [vmem:[%s1942_s5 + $0x158] sm:$0xff] %v798_v3  ;;  %v704_v12 = vadd.f32 %v1021_v8, %v640_v42  ;;  %v736_v13 = vadd.f32 %v1069_v9, %v672_v43  ;;  %v226_v14 = vpop.f32.mrb[13].mxu0  ;;  %v386_v15 = vpop.f32.mrb[13].mxu1  ;;  %v676_v28 = vadd.f32 %v1437_v31, %v605_v5  ;;  %v508_v8 = vld [vmem:[%s1939_s0 + $0xb8] sm:$0xff] }
 0x111   :  { %829 = vst [vmem:[%s1942_s5 + $0x50] sm:$0xff] %v765_v6  ;;  %861 = vst [vmem:[%s1942_s5 + $0x150] sm:$0xff] %v797_v7  ;;  %v703_v18 = vadd.f32 %v639_v50, %v226_v14  ;;  %v735_v19 = vadd.f32 %v671_v51, %v386_v15  ;;  %v643_v36 = vadd.f32 %v1437_v31, %v572_v10  ;;  %v540_v9 = vld [vmem:[%s1939_s0 + $0x1b8] sm:$0xff]  ;;  %v507_v14 = vld [vmem:[%s1939_s0 + $0xb0] sm:$0xff] }
 0x112   :  { %v768_v24 = vmax.f32 %v704_v12, 0.0  ;;  %v800_v26 = vmax.f32 %v736_v13, 0.0  ;;  %v675_v37 = vadd.f32 %v1437_v31, %v604_v11  ;;  %v575_v44 = vmul.f32 %v1421_v25, %v504_v22  ;;  %v539_v15 = vld [vmem:[%s1939_s0 + $0x1b0] sm:$0xff]  ;;  %v510_v22 = vld [vmem:[%s1939_s0 + $0xc8] sm:$0xff] }
 0x113   :  { %v767_v32 = vmax.f32 %v703_v18, 0.0  ;;  %v799_v33 = vmax.f32 %v735_v19, 0.0  ;;  %v1024_v34 = vpop.f32.mrb[14].mxu0  ;;  %v1072_v35 = vpop.f32.mrb[14].mxu1  ;;  %v607_v45 = vmul.f32 %v1421_v25, %v536_v23  ;;  %v574_v50 = vmul.f32 %v1421_v25, %v503_v29  ;;  %v542_v23 = vld [vmem:[%s1939_s0 + $0x1c8] sm:$0xff] }
 0x114   :  { %832 = vst [vmem:[%s1942_s5 + $0x68] sm:$0xff] %v768_v24  ;;  %864 = vst [vmem:[%s1942_s5 + $0x168] sm:$0xff] %v800_v26  ;;  %v706_v40 = vadd.f32 %v1024_v34, %v642_v16  ;;  %v738_v41 = vadd.f32 %v1072_v35, %v674_v17  ;;  %v236_v42 = vpop.f32.mrb[15].mxu0  ;;  %v396_v43 = vpop.f32.mrb[15].mxu1  ;;  %v606_v51 = vmul.f32 %v1421_v25, %v535_v30 }
 0x115   :  { %831 = vst [vmem:[%s1942_s5 + $0x60] sm:$0xff] %v767_v32  ;;  %863 = vst [vmem:[%s1942_s5 + $0x160] sm:$0xff] %v799_v33  ;;  %v705_v48 = vadd.f32 %v641_v20, %v236_v42  ;;  %v737_v49 = vadd.f32 %v673_v21, %v396_v43  ;;  %v577_v54 = vmul.f32 %v1421_v25, %v506_v38  ;;  %v509_v32 = vld [vmem:[%s1939_s0 + $0xc0] sm:$0xff] }
 0x116   :  { %v770_v52 = vmax.f32 %v706_v40, 0.0  ;;  %v802_v53 = vmax.f32 %v738_v41, 0.0  ;;  %v609_v55 = vmul.f32 %v1421_v25, %v538_v39  ;;  %v576_v60 = vmul.f32 %v1421_v25, %v505_v46  ;;  %v541_v33 = vld [vmem:[%s1939_s0 + $0x1c0] sm:$0xff] }
 0x117   :  { %v769_v56 = vmax.f32 %v705_v48, 0.0  ;;  %v801_v57 = vmax.f32 %v737_v49, 0.0  ;;  %v1027_v58 = vpop.f32.mrb[16].mxu0  ;;  %v1075_v59 = vpop.f32.mrb[16].mxu1  ;;  %v608_v61 = vmul.f32 %v1421_v25, %v537_v47  ;;  %v646_v2 = vadd.f32 %v1437_v31, %v575_v44 }
 0x118   :  { %834 = vst [vmem:[%s1942_s5 + $0x78] sm:$0xff] %v770_v52  ;;  %866 = vst [vmem:[%s1942_s5 + $0x178] sm:$0xff] %v802_v53  ;;  %v708_v62 = vadd.f32 %v1027_v58, %v644_v27  ;;  %v740_v63 = vadd.f32 %v1075_v59, %v676_v28  ;;  %v246_v0 = vpop.f32.mrb[17].mxu0  ;;  %v406_v1 = vpop.f32.mrb[17].mxu1  ;;  %v678_v3 = vadd.f32 %v1437_v31, %v607_v45  ;;  %v512_v58 = vld [vmem:[%s1939_s0 + $0xd8] sm:$0xff] }
 0x119   :  { %833 = vst [vmem:[%s1942_s5 + $0x70] sm:$0xff] %v769_v56  ;;  %865 = vst [vmem:[%s1942_s5 + $0x170] sm:$0xff] %v801_v57  ;;  %v707_v4 = vadd.f32 %v643_v36, %v246_v0  ;;  %v739_v5 = vadd.f32 %v675_v37, %v406_v1  ;;  %v645_v6 = vadd.f32 %v1437_v31, %v574_v50  ;;  %v544_v59 = vld [vmem:[%s1939_s0 + $0x1d8] sm:$0xff]  ;;  %v511_v0 = vld [vmem:[%s1939_s0 + $0xd0] sm:$0xff] }
 0x11a   :  { %v677_v7 = vadd.f32 %v1437_v31, %v606_v51  ;;  %v772_v10 = vmax.f32 %v708_v62, 0.0  ;;  %v804_v11 = vmax.f32 %v740_v63, 0.0  ;;  %v648_v12 = vadd.f32 %v1437_v31, %v577_v54  ;;  %v543_v1 = vld [vmem:[%s1939_s0 + $0x1d0] sm:$0xff] }
 0x11b   :  { %v680_v13 = vadd.f32 %v1437_v31, %v609_v55  ;;  %v771_v16 = vmax.f32 %v707_v4, 0.0  ;;  %v803_v17 = vmax.f32 %v739_v5, 0.0  ;;  %v1030_v18 = vpop.f32.mrb[18].mxu0  ;;  %v1078_v19 = vpop.f32.mrb[18].mxu1  ;;  %v647_v20 = vadd.f32 %v1437_v31, %v576_v60 }
 0x11c   :  { %v679_v21 = vadd.f32 %v1437_v31, %v608_v61  ;;  %836 = vst [vmem:[%s1942_s5 + $0x88] sm:$0xff] %v772_v10  ;;  %868 = vst [vmem:[%s1942_s5 + $0x188] sm:$0xff] %v804_v11  ;;  %v710_v24 = vadd.f32 %v1030_v18, %v646_v2  ;;  %v742_v26 = vadd.f32 %v1078_v19, %v678_v3  ;;  %v256_v27 = vpop.f32.mrb[19].mxu0  ;;  %v416_v28 = vpop.f32.mrb[19].mxu1 }
 0x11d   :  { %v579_v29 = vmul.f32 %v1421_v25, %v508_v8  ;;  %v611_v30 = vmul.f32 %v1421_v25, %v540_v9  ;;  %835 = vst [vmem:[%s1942_s5 + $0x80] sm:$0xff] %v771_v16  ;;  %867 = vst [vmem:[%s1942_s5 + $0x180] sm:$0xff] %v803_v17  ;;  %v709_v34 = vadd.f32 %v645_v6, %v256_v27  ;;  %v514_v8 = vld [vmem:[%s1939_s0 + $0xe8] sm:$0xff]  ;;  %v513_v16 = vld [vmem:[%s1939_s0 + $0xe0] sm:$0xff] }
 0x11e   :  { %v741_v35 = vadd.f32 %v677_v7, %v416_v28  ;;  %v578_v36 = vmul.f32 %v1421_v25, %v507_v14  ;;  %v610_v37 = vmul.f32 %v1421_v25, %v539_v15  ;;  %v774_v38 = vmax.f32 %v710_v24, 0.0  ;;  %v546_v9 = vld [vmem:[%s1939_s0 + $0x1e8] sm:$0xff]  ;;  %v545_v17 = vld [vmem:[%s1939_s0 + $0x1e0] sm:$0xff] }
 0x11f   :  { %v806_v39 = vmax.f32 %v742_v26, 0.0  ;;  %v581_v40 = vmul.f32 %v1421_v25, %v510_v22  ;;  %v613_v41 = vmul.f32 %v1421_v25, %v542_v23  ;;  %v773_v42 = vmax.f32 %v709_v34, 0.0  ;;  %v1033_v44 = vpop.f32.mrb[20].mxu0  ;;  %v1081_v45 = vpop.f32.mrb[20].mxu1 }
 0x120   :  { %v805_v43 = vmax.f32 %v741_v35, 0.0  ;;  %v580_v46 = vmul.f32 %v1421_v25, %v509_v32  ;;  %v612_v47 = vmul.f32 %v1421_v25, %v541_v33  ;;  %838 = vst [vmem:[%s1942_s5 + $0x98] sm:$0xff] %v774_v38  ;;  %v712_v48 = vadd.f32 %v1033_v44, %v648_v12  ;;  %v266_v50 = vpop.f32.mrb[21].mxu0  ;;  %v426_v51 = vpop.f32.mrb[21].mxu1  ;;  %v516_v44 = vld [vmem:[%s1939_s0 + $0xf8] sm:$0xff] }
 0x121   :  { %870 = vst [vmem:[%s1942_s5 + $0x198] sm:$0xff] %v806_v39  ;;  %v744_v49 = vadd.f32 %v1081_v45, %v680_v13  ;;  %v650_v52 = vadd.f32 %v1437_v31, %v579_v29  ;;  %v682_v53 = vadd.f32 %v1437_v31, %v611_v30  ;;  %837 = vst [vmem:[%s1942_s5 + $0x90] sm:$0xff] %v773_v42  ;;  %v548_v45 = vld [vmem:[%s1939_s0 + $0x1f8] sm:$0xff] }
 0x122   :  { %869 = vst [vmem:[%s1942_s5 + $0x190] sm:$0xff] %v805_v43  ;;  %v711_v54 = vadd.f32 %v647_v20, %v266_v50  ;;  %v743_v55 = vadd.f32 %v679_v21, %v426_v51  ;;  %v649_v56 = vadd.f32 %v1437_v31, %v578_v36  ;;  %v681_v57 = vadd.f32 %v1437_v31, %v610_v37  ;;  %v515_v50 = vld [vmem:[%s1939_s0 + $0xf0] sm:$0xff] }
 0x123   :  { %v776_v60 = vmax.f32 %v712_v48, 0.0  ;;  %v808_v61 = vmax.f32 %v744_v49, 0.0  ;;  %v652_v62 = vadd.f32 %v1437_v31, %v581_v40  ;;  %v684_v63 = vadd.f32 %v1437_v31, %v613_v41  ;;  %v1036_v4 = vpop.f32.mrb[22].mxu0  ;;  %v1084_v5 = vpop.f32.mrb[22].mxu1  ;;  %v547_v51 = vld [vmem:[%s1939_s0 + $0x1f0] sm:$0xff] }
 0x124   :  { %v775_v2 = vmax.f32 %v711_v54, 0.0  ;;  %v807_v3 = vmax.f32 %v743_v55, 0.0  ;;  %v651_v6 = vadd.f32 %v1437_v31, %v580_v46  ;;  %v683_v7 = vadd.f32 %v1437_v31, %v612_v47  ;;  %v276_v12 = vpop.f32.mrb[23].mxu0  ;;  %v436_v13 = vpop.f32.mrb[23].mxu1 }
 0x125   :  { %840 = vst [vmem:[%s1942_s5 + $0xa8] sm:$0xff] %v776_v60  ;;  %872 = vst [vmem:[%s1942_s5 + $0x1a8] sm:$0xff] %v808_v61  ;;  %v714_v10 = vadd.f32 %v1036_v4, %v650_v52  ;;  %v746_v11 = vadd.f32 %v1084_v5, %v682_v53  ;;  %v583_v14 = vmul.f32 %v1421_v25, %v512_v58 }
 0x126   :  { %v615_v15 = vmul.f32 %v1421_v25, %v544_v59  ;;  %839 = vst [vmem:[%s1942_s5 + $0xa0] sm:$0xff] %v775_v2  ;;  %871 = vst [vmem:[%s1942_s5 + $0x1a0] sm:$0xff] %v807_v3  ;;  %v713_v18 = vadd.f32 %v649_v56, %v276_v12  ;;  %v745_v19 = vadd.f32 %v681_v57, %v436_v13 }
 0x127   :  { %v582_v20 = vmul.f32 %v1421_v25, %v511_v0  ;;  %v614_v21 = vmul.f32 %v1421_v25, %v543_v1  ;;  %v778_v22 = vmax.f32 %v714_v10, 0.0  ;;  %v810_v23 = vmax.f32 %v746_v11, 0.0  ;;  %v1039_v29 = vpop.f32.mrb[24].mxu0  ;;  %v1087_v30 = vpop.f32.mrb[24].mxu1 }
 0x128   :  { %v585_v24 = vmul.f32 %v1421_v25, %v514_v8  ;;  %v617_v26 = vmul.f32 %v1421_v25, %v546_v9  ;;  %v777_v27 = vmax.f32 %v713_v18, 0.0  ;;  %v809_v28 = vmax.f32 %v745_v19, 0.0  ;;  %v286_v36 = vpop.f32.mrb[25].mxu0  ;;  %v446_v37 = vpop.f32.mrb[25].mxu1 }
 0x129   :  { %v584_v32 = vmul.f32 %v1421_v25, %v513_v16  ;;  %v616_v33 = vmul.f32 %v1421_v25, %v545_v17  ;;  %842 = vst [vmem:[%s1942_s5 + $0xb8] sm:$0xff] %v778_v22  ;;  %874 = vst [vmem:[%s1942_s5 + $0x1b8] sm:$0xff] %v810_v23  ;;  %v716_v34 = vadd.f32 %v1039_v29, %v652_v62 }
 0x12a   :  { %v748_v35 = vadd.f32 %v1087_v30, %v684_v63  ;;  %v654_v38 = vadd.f32 %v1437_v31, %v583_v14  ;;  %v686_v39 = vadd.f32 %v1437_v31, %v615_v15  ;;  %841 = vst [vmem:[%s1942_s5 + $0xb0] sm:$0xff] %v777_v27  ;;  %873 = vst [vmem:[%s1942_s5 + $0x1b0] sm:$0xff] %v809_v28 }
 0x12b   :  { %v715_v40 = vadd.f32 %v651_v6, %v286_v36  ;;  %v747_v41 = vadd.f32 %v683_v7, %v446_v37  ;;  %v653_v42 = vadd.f32 %v1437_v31, %v582_v20  ;;  %v685_v43 = vadd.f32 %v1437_v31, %v614_v21  ;;  %v1042_v54 = vpop.f32.mrb[26].mxu0  ;;  %v1090_v55 = vpop.f32.mrb[26].mxu1 }
 0x12c   :  { %v780_v46 = vmax.f32 %v716_v34, 0.0  ;;  %v812_v47 = vmax.f32 %v748_v35, 0.0  ;;  %v656_v48 = vadd.f32 %v1437_v31, %v585_v24  ;;  %v688_v49 = vadd.f32 %v1437_v31, %v617_v26  ;;  %v296_v60 = vpop.f32.mrb[27].mxu0  ;;  %v456_v61 = vpop.f32.mrb[27].mxu1 }
 0x12d   :  { %v779_v52 = vmax.f32 %v715_v40, 0.0  ;;  %v811_v53 = vmax.f32 %v747_v41, 0.0  ;;  %v655_v56 = vadd.f32 %v1437_v31, %v584_v32  ;;  %v687_v57 = vadd.f32 %v1437_v31, %v616_v33 }
 0x12e   :  { %844 = vst [vmem:[%s1942_s5 + $0xc8] sm:$0xff] %v780_v46  ;;  %876 = vst [vmem:[%s1942_s5 + $0x1c8] sm:$0xff] %v812_v47  ;;  %v718_v58 = vadd.f32 %v1042_v54, %v654_v38  ;;  %v750_v59 = vadd.f32 %v1090_v55, %v686_v39  ;;  %v587_v62 = vmul.f32 %v1421_v25, %v516_v44 }
 0x12f   :  { %v619_v63 = vmul.f32 %v1421_v25, %v548_v45  ;;  %843 = vst [vmem:[%s1942_s5 + $0xc0] sm:$0xff] %v779_v52  ;;  %875 = vst [vmem:[%s1942_s5 + $0x1c0] sm:$0xff] %v811_v53  ;;  %v717_v0 = vadd.f32 %v653_v42, %v296_v60  ;;  %v749_v1 = vadd.f32 %v685_v43, %v456_v61  ;;  %v1045_v8 = vpop.f32.mrb[28].mxu0  ;;  %v1093_v9 = vpop.f32.mrb[28].mxu1 }
 0x130   :  { %v586_v2 = vmul.f32 %v1421_v25, %v515_v50  ;;  %v618_v3 = vmul.f32 %v1421_v25, %v547_v51  ;;  %v782_v4 = vmax.f32 %v718_v58, 0.0  ;;  %v814_v5 = vmax.f32 %v750_v59, 0.0  ;;  %v306_v12 = vpop.f32.mrb[29].mxu0  ;;  %v466_v13 = vpop.f32.mrb[29].mxu1 }
 0x131   :  { %v781_v6 = vmax.f32 %v717_v0, 0.0  ;;  %v813_v7 = vmax.f32 %v749_v1, 0.0  ;;  %v720_v10 = vadd.f32 %v1045_v8, %v656_v48  ;;  %v752_v11 = vadd.f32 %v1093_v9, %v688_v49 }
 0x132   :  { %846 = vst [vmem:[%s1942_s5 + $0xd8] sm:$0xff] %v782_v4  ;;  %878 = vst [vmem:[%s1942_s5 + $0x1d8] sm:$0xff] %v814_v5  ;;  %v658_v25 = vadd.f32 %v1437_v31, %v587_v62  ;;  %v690_v14 = vadd.f32 %v1437_v31, %v619_v63  ;;  %v719_v15 = vadd.f32 %v655_v56, %v306_v12 }
 0x133   :  { %845 = vst [vmem:[%s1942_s5 + $0xd0] sm:$0xff] %v781_v6  ;;  %877 = vst [vmem:[%s1942_s5 + $0x1d0] sm:$0xff] %v813_v7  ;;  %v751_v16 = vadd.f32 %v687_v57, %v466_v13  ;;  %v657_v17 = vadd.f32 %v1437_v31, %v586_v2  ;;  %v689_v18 = vadd.f32 %v1437_v31, %v618_v3  ;;  %v784_v19 = vmax.f32 %v720_v10, 0.0  ;;  %v1048_v23 = vpop.f32.mrb[30].mxu0  ;;  %v1096_v24 = vpop.f32.mrb[30].mxu1 }
 0x134   :  { %v816_v20 = vmax.f32 %v752_v11, 0.0  ;;  %v783_v21 = vmax.f32 %v719_v15, 0.0  ;;  %v722_v26 = vadd.f32 %v1048_v23, %v658_v25  ;;  %v754_v27 = vadd.f32 %v1096_v24, %v690_v14  ;;  %v316_v28 = vpop.f32.mrb[31].mxu0  ;;  %v476_v29 = vpop.f32.mrb[31].mxu1 }
 0x135   :  { %v815_v22 = vmax.f32 %v751_v16, 0.0  ;;  %848 = vst [vmem:[%s1942_s5 + $0xe8] sm:$0xff] %v784_v19  ;;  %v721_v31 = vadd.f32 %v657_v17, %v316_v28  ;;  %v753_v30 = vadd.f32 %v689_v18, %v476_v29 }
 0x136   :  { %880 = vst [vmem:[%s1942_s5 + $0x1e8] sm:$0xff] %v816_v20  ;;  %847 = vst [vmem:[%s1942_s5 + $0xe0] sm:$0xff] %v783_v21  ;;  %v786_v32 = vmax.f32 %v722_v26, 0.0  ;;  %v818_v33 = vmax.f32 %v754_v27, 0.0 }
 0x137   :  { %879 = vst [vmem:[%s1942_s5 + $0x1e0] sm:$0xff] %v815_v22  ;;  %v785_v34 = vmax.f32 %v721_v31, 0.0  ;;  %v817_v35 = vmax.f32 %v753_v30, 0.0 }
 0x138   :  { %850 = vst [vmem:[%s1942_s5 + $0xf8] sm:$0xff] %v786_v32  ;;  %882 = vst [vmem:[%s1942_s5 + $0x1f8] sm:$0xff] %v818_v33 }
 0x139   :  { %849 = vst [vmem:[%s1942_s5 + $0xf0] sm:$0xff] %v785_v34  ;;  %881 = vst [vmem:[%s1942_s5 + $0x1f0] sm:$0xff] %v817_v35 }

</bundles_post_ra>
